<compile_context>
chip_gen: v5e
topology: v5e:2x2
jax: 0.10.0
libtpu: 0.0.40
codegen_flags: <defaults>
</compile_context>

<pallas_src>
import functools
import math

import jax
import jax.numpy as jnp
from jax.experimental import pallas as pl
from jax.experimental.pallas import tpu as pltpu

LN_EPS = 1e-5


def _layernorm(x, gamma, beta):
    # x: (T, D) f32, gamma/beta: (1, D) f32
    mean = jnp.mean(x, axis=-1, keepdims=True)
    var = jnp.mean((x - mean) ** 2, axis=-1, keepdims=True)
    return (x - mean) * jax.lax.rsqrt(var + LN_EPS) * gamma + beta


def _gelu_exact(x):
    # matches torch.nn.functional.gelu (erf-based, non-approximate)
    return 0.5 * x * (1.0 + jax.lax.erf(x * (1.0 / math.sqrt(2.0))))


def make_block_kernel():
    def block_kernel(xf_ref, xq_ref, g1_ref, be1_ref, g2_ref, be2_ref,
                     wqkv_ref, wo_ref, w1_ref, b1_ref, w2_ref, b2_ref,
                     o_ref, q_scr, k_scr, v_scr, attn_scr):
        S = xf_ref.shape[1]
        D = xf_ref.shape[2]
        tq = o_ref.shape[1]
        nq = S // tq
        H, _, Dh = q_scr.shape
        scale = 1.0 / math.sqrt(Dh)
        qi = pl.program_id(1)

        # ---- once per batch element (q-tile 0): LN1 + fused QKV projection ----
        # One (S,D)x(D,3D) MXU pass instead of three; result staged head-major
        # into bf16 VMEM scratch (relayout copies happen once per batch, not
        # per head per matmul).  1/sqrt(Dh) is folded into the Q store.
        @pl.when(qi == 0)
        def _stage_qkv():
            xf = xf_ref[0]                                             # (S, D) f32
            xn = _layernorm(xf, g1_ref[...], be1_ref[...])
            qkv = jnp.dot(xn.astype(jnp.bfloat16), wqkv_ref[...],
                          preferred_element_type=jnp.float32)          # (S, 3D) f32
            for h in range(H):                                         # static unroll
                lo = h * Dh
                q_scr[h] = (qkv[:, lo:lo + Dh] * scale).astype(jnp.bfloat16)
                k_scr[h] = qkv[:, D + lo:D + lo + Dh].astype(jnp.bfloat16)
                v_scr[h] = qkv[:, 2 * D + lo:2 * D + lo + Dh].astype(jnp.bfloat16)

        # ---- batched-head attention for this q-tile ----
        if nq == 1:
            q = q_scr[...]                                             # (H, tq, Dh)
        else:
            start = pl.multiple_of(qi * tq, tq)
            q = q_scr[:, pl.ds(start, tq), :]
        k = k_scr[...]                                                 # (H, S, Dh)
        v = v_scr[...]

        s = jnp.einsum('hqd,hkd->hqk', q, k,
                       preferred_element_type=jnp.float32)             # (H, tq, S)
        s = s - jnp.max(s, axis=-1, keepdims=True)
        p = jnp.exp(s)
        p = p * pl.reciprocal(jnp.sum(p, axis=-1, keepdims=True), approx=True)
        ctx = jnp.einsum('hqk,hkd->hqd', p.astype(jnp.bfloat16), v,
                         preferred_element_type=jnp.float32)           # (H, tq, Dh)

        # Merge heads by writing directly into a lane-dense scratch slab that
        # feeds the output projection (no jnp.concatenate of head_outs).
        for h in range(H):
            attn_scr[:, h * Dh:(h + 1) * Dh] = ctx[h].astype(jnp.bfloat16)
        attn = jnp.dot(attn_scr[...], wo_ref[...],
                       preferred_element_type=jnp.float32)             # (tq, D)

        x1 = xq_ref[0] + attn                                          # residual (f32)

        # ---- pre-norm MLP ----
        xn2 = _layernorm(x1, g2_ref[...], be2_ref[...])
        h1 = jnp.dot(xn2.astype(jnp.bfloat16), w1_ref[...],
                     preferred_element_type=jnp.float32) + b1_ref[...]
        h1 = _gelu_exact(h1)
        # TODO(synk): dropout (p_dropout) omitted — inference semantics (identity).
        h2 = jnp.dot(h1.astype(jnp.bfloat16), w2_ref[...],
                     preferred_element_type=jnp.float32) + b2_ref[...]

        o_ref[0] = x1 + h2

    return block_kernel


def attention_block_forward(x, params, n_heads, *, q_tile=128):
    """One AttentionBlock forward. x: (B, S, D) float32."""
    B, S, D = x.shape
    assert D % n_heads == 0
    d_mlp = params["w1"].shape[1]
    H = n_heads
    Dh = D // H

    # Sequence-tile grid axis (tq == S for small S); bounds the (tq, S) score
    # matrix in VMEM and gives the pipeliner per-batch work to overlap.
    tq = min(q_tile, S)
    if S % tq != 0:
        tq = S
    nq = S // tq
    # TODO(synk): for very long S, a flash-style kv-tile axis (online softmax)
    # would replace the full (H, S, Dh) K/V scratch.

    bf16 = jnp.bfloat16
    # Fused QKV weight (D, 3D); all matmul weights in bf16 (halves HBM/VMEM).
    wqkv = jnp.concatenate([params["wq"], params["wk"], params["wv"]],
                           axis=1).astype(bf16)
    wo = params["wo"].astype(bf16)
    w1 = params["w1"].astype(bf16)
    w2 = params["w2"].astype(bf16)

    const2d = lambda shape: pl.BlockSpec(shape, lambda b, q: (0, 0))

    in_specs = [
        pl.BlockSpec((1, S, D), lambda b, q: (b, 0, 0)),    # x, full seq (resident)
        pl.BlockSpec((1, tq, D), lambda b, q: (b, q, 0)),   # x, query/residual tile
        const2d((1, D)), const2d((1, D)),                   # ln1 gamma / beta (f32)
        const2d((1, D)), const2d((1, D)),                   # ln2 gamma / beta (f32)
        const2d((D, 3 * D)),                                # fused Wqkv (bf16)
        const2d((D, D)),                                    # Wo (bf16)
        const2d((D, d_mlp)),                                # W1 (bf16)
        const2d((1, d_mlp)),                                # b1 (f32)
        const2d((d_mlp, D)),                                # W2 (bf16)
        const2d((1, D)),                                    # b2 (f32)
    ]
    out_spec = pl.BlockSpec((1, tq, D), lambda b, q: (b, q, 0))

    scratch_shapes = [
        pltpu.VMEM((H, S, Dh), bf16),   # Q (head-major, pre-scaled)
        pltpu.VMEM((H, S, Dh), bf16),   # K
        pltpu.VMEM((H, S, Dh), bf16),   # V
        pltpu.VMEM((tq, D), bf16),      # merged heads -> Wo input (lane-dense)
    ]

    # VMEM budget / cost estimate (explicit, instead of relying on defaults).
    weight_bytes = 2 * (3 * D * D + D * D + 2 * D * d_mlp)
    small_bytes = 4 * (5 * D + d_mlp)
    act_bytes = 4 * (S * D + 2 * tq * D)
    scr_bytes = 2 * (3 * H * S * Dh + tq * D)
    est = 2 * (weight_bytes + small_bytes + act_bytes) + scr_bytes
    vmem_limit = int(min(max(4 * est, 32 * 1024 * 1024), 64 * 1024 * 1024))

    flops = 2 * B * S * D * (3 * D + 2 * S + D + 2 * d_mlp)
    transcendentals = B * S * (H * S + d_mlp + 4)
    bytes_accessed = 3 * 4 * B * S * D + weight_bytes + small_bytes

    return pl.pallas_call(
        make_block_kernel(),
        out_shape=jax.ShapeDtypeStruct((B, S, D), jnp.float32),
        grid_spec=pltpu.PrefetchScalarGridSpec(
            num_scalar_prefetch=0,
            grid=(B, nq),
            in_specs=in_specs,
            out_specs=out_spec,
            scratch_shapes=scratch_shapes,
        ),
        compiler_params=pltpu.CompilerParams(
            dimension_semantics=("parallel", "arbitrary"),
            vmem_limit_bytes=vmem_limit,
        ),
        cost_estimate=pl.CostEstimate(
            flops=int(flops),
            transcendentals=int(transcendentals),
            bytes_accessed=int(bytes_accessed),
        ),
    )(
        x, x,
        params["ln1_g"], params["ln1_b"], params["ln2_g"], params["ln2_b"],
        wqkv, wo, w1, params["b1"], w2, params["b2"],
    )


def transformer_forward(x, layer_params, n_heads):
    # TODO(synk): cross-layer fusion / next-layer weight prefetch (P10) would hide
    # per-layer launch + weight DMA latency; kept as one fused kernel per layer.
    for p in layer_params:
        x = attention_block_forward(x, p, n_heads)
    return x


def init_params(key, d: int, d_mlp: int, n_layers: int):
    """Deterministic synthetic parameters (shapes match the PyTorch module)."""
    layers = []
    for _ in range(n_layers):
        key, *ks = jax.random.split(key, 12)
        s = 0.02
        layers.append({
            "ln1_g": 1.0 + 0.1 * jax.random.normal(ks[0], (1, d), jnp.float32),
            "ln1_b": 0.1 * jax.random.normal(ks[1], (1, d), jnp.float32),
            "ln2_g": 1.0 + 0.1 * jax.random.normal(ks[2], (1, d), jnp.float32),
            "ln2_b": 0.1 * jax.random.normal(ks[3], (1, d), jnp.float32),
            # MultiheadAttention (bias=False): q/k/v/out projections, stored
            # pre-transposed so the kernel computes x @ W.
            "wq": s * jax.random.normal(ks[4], (d, d), jnp.float32),
            "wk": s * jax.random.normal(ks[5], (d, d), jnp.float32),
            "wv": s * jax.random.normal(ks[6], (d, d), jnp.float32),
            "wo": s * jax.random.normal(ks[7], (d, d), jnp.float32),
            # MLP (Linear weights pre-transposed, biases as (1, n)).
            "w1": s * jax.random.normal(ks[8], (d, d_mlp), jnp.float32),
            "b1": 0.02 * jax.random.normal(ks[9], (1, d_mlp), jnp.float32),
            "w2": s * jax.random.normal(ks[10], (d_mlp, d), jnp.float32),
            "b2": jnp.zeros((1, d), jnp.float32),
        })
    return layers


def _reference_block(x, p, n_heads):
    """Pure-JAX f32 reference of one AttentionBlock (for sanity checking)."""
    B, S, D = x.shape
    H = n_heads
    Dh = D // H

    def ln(z, g, b):
        m = z.mean(-1, keepdims=True)
        v = ((z - m) ** 2).mean(-1, keepdims=True)
        return (z - m) / jnp.sqrt(v + LN_EPS) * g + b

    xn = ln(x, p["ln1_g"], p["ln1_b"])
    q = xn @ p["wq"]
    k = xn @ p["wk"]
    v = xn @ p["wv"]
    split = lambda t: t.reshape(B, S, H, Dh).transpose(0, 2, 1, 3)
    qh, kh, vh = split(q), split(k), split(v)
    s = jnp.einsum('bhqd,bhkd->bhqk', qh, kh) / math.sqrt(Dh)
    pr = jax.nn.softmax(s, axis=-1)
    ctx = jnp.einsum('bhqk,bhkd->bhqd', pr, vh)
    ctx = ctx.transpose(0, 2, 1, 3).reshape(B, S, D)
    x = x + ctx @ p["wo"]
    xn2 = ln(x, p["ln2_g"], p["ln2_b"])
    h = xn2 @ p["w1"] + p["b1"]
    h = 0.5 * h * (1.0 + jax.lax.erf(h / math.sqrt(2.0)))
    return x + h @ p["w2"] + p["b2"]


if __name__ == "__main__":
    # Small config consistent with the module: d=32, d_mlp=64, n_heads=4, n_layers=2
    B, S, d, d_mlp, n_heads, n_layers = 2, 8, 32, 64, 4, 2

    key = jax.random.PRNGKey(0)
    kx, kp = jax.random.split(key)
    x = jax.random.normal(kx, (B, S, d), jnp.float32)
    params = init_params(kp, d, d_mlp, n_layers)

    fwd = jax.jit(functools.partial(transformer_forward, n_heads=n_heads))
    out = jax.block_until_ready(fwd(x, params))
    assert out.shape == (B, S, d) and out.dtype == jnp.float32

    ref = x
    for p in params:
        ref = _reference_block(ref, p, n_heads)
    err = float(jnp.max(jnp.abs(out - ref)))
    assert err < 5e-2, f"max abs error vs f32 reference: {err}"

    print("KERNEL_OK")
</pallas_src>

<mosaic_0001>
module attributes {stable_mosaic.version = 11 : i64} {
  func.func @block_kernel(%arg0: i32, %arg1: i32, %arg2: memref<1x8x32xf32, #tpu.memory_space<vmem>>, %arg3: memref<1x8x32xf32, #tpu.memory_space<vmem>>, %arg4: memref<1x32xf32, #tpu.memory_space<vmem>>, %arg5: memref<1x32xf32, #tpu.memory_space<vmem>>, %arg6: memref<1x32xf32, #tpu.memory_space<vmem>>, %arg7: memref<1x32xf32, #tpu.memory_space<vmem>>, %arg8: memref<32x96xbf16, #tpu.memory_space<vmem>>, %arg9: memref<32x32xbf16, #tpu.memory_space<vmem>>, %arg10: memref<32x64xbf16, #tpu.memory_space<vmem>>, %arg11: memref<1x64xf32, #tpu.memory_space<vmem>>, %arg12: memref<64x32xbf16, #tpu.memory_space<vmem>>, %arg13: memref<1x32xf32, #tpu.memory_space<vmem>>, %arg14: memref<1x8x32xf32, #tpu.memory_space<vmem>>, %arg15: memref<4x8x8xbf16, #tpu.memory_space<vmem>>, %arg16: memref<4x8x8xbf16, #tpu.memory_space<vmem>>, %arg17: memref<4x8x8xbf16, #tpu.memory_space<vmem>>, %arg18: memref<8x32xbf16, #tpu.memory_space<vmem>>) attributes {dimension_semantics = [#tpu.dimension_semantics<parallel>, #tpu.dimension_semantics<arbitrary>], iteration_bounds = array<i64: 2, 1>, scalar_prefetch = 0 : i64, scratch_operands = 4 : i64, tpu.core_type = #tpu.core_type<tc>, window_params = [{transform_indices = @transform_0, window_bounds = array<i64: 1, 8, 32>}, {transform_indices = @transform_1, window_bounds = array<i64: 1, 8, 32>}, {pipeline_mode = #tpu.pipeline_mode<synchronous>, transform_indices = @transform_2, window_bounds = array<i64: 1, 32>}, {pipeline_mode = #tpu.pipeline_mode<synchronous>, transform_indices = @transform_3, window_bounds = array<i64: 1, 32>}, {pipeline_mode = #tpu.pipeline_mode<synchronous>, transform_indices = @transform_4, window_bounds = array<i64: 1, 32>}, {pipeline_mode = #tpu.pipeline_mode<synchronous>, transform_indices = @transform_5, window_bounds = array<i64: 1, 32>}, {pipeline_mode = #tpu.pipeline_mode<synchronous>, transform_indices = @transform_6, window_bounds = array<i64: 32, 96>}, {pipeline_mode = #tpu.pipeline_mode<synchronous>, transform_indices = @transform_7, window_bounds = array<i64: 32, 32>}, {pipeline_mode = #tpu.pipeline_mode<synchronous>, transform_indices = @transform_8, window_bounds = array<i64: 32, 64>}, {pipeline_mode = #tpu.pipeline_mode<synchronous>, transform_indices = @transform_9, window_bounds = array<i64: 1, 64>}, {pipeline_mode = #tpu.pipeline_mode<synchronous>, transform_indices = @transform_10, window_bounds = array<i64: 64, 32>}, {pipeline_mode = #tpu.pipeline_mode<synchronous>, transform_indices = @transform_11, window_bounds = array<i64: 1, 32>}, {transform_indices = @transform_12, window_bounds = array<i64: 1, 8, 32>}]} {
    %c0_i32 = arith.constant 0 : i32
    %0 = arith.cmpi eq, %arg1, %c0_i32 : i32
    %1 = arith.extui %0 : i1 to i32
    %c0_i32_0 = arith.constant 0 : i32
    %2 = arith.cmpi ne, %1, %c0_i32_0 : i32
    scf.if %2 {
      %c0_50 = arith.constant 0 : index
      %c0_51 = arith.constant 0 : index
      %c0_52 = arith.constant 0 : index
      %89 = vector.load %arg2[%c0_50, %c0_51, %c0_52] : memref<1x8x32xf32, #tpu.memory_space<vmem>>, vector<1x8x32xf32>
      %90 = vector.shape_cast %89 : vector<1x8x32xf32> to vector<8x32xf32>
      %c0_53 = arith.constant 0 : index
      %c0_54 = arith.constant 0 : index
      %91 = vector.load %arg4[%c0_53, %c0_54] : memref<1x32xf32, #tpu.memory_space<vmem>>, vector<1x32xf32>
      %c0_55 = arith.constant 0 : index
      %c0_56 = arith.constant 0 : index
      %92 = vector.load %arg5[%c0_55, %c0_56] : memref<1x32xf32, #tpu.memory_space<vmem>>, vector<1x32xf32>
      %cst_57 = arith.constant dense<0.000000e+00> : vector<8xf32>
      %93 = vector.multi_reduction <add>, %90, %cst_57 [1] : vector<8x32xf32> to vector<8xf32>
      %94 = vector.shape_cast %93 : vector<8xf32> to vector<8x1xf32>
      %cst_58 = arith.constant 3.200000e+01 : f32
      %95 = vector.broadcast %cst_58 : f32 to vector<8x1xf32>
      %96 = arith.divf %94, %95 : vector<8x1xf32>
      %97 = vector.broadcast %96 : vector<8x1xf32> to vector<8x32xf32>
      %98 = arith.subf %90, %97 : vector<8x32xf32>
      %99 = arith.mulf %98, %98 : vector<8x32xf32>
      %cst_59 = arith.constant dense<0.000000e+00> : vector<8xf32>
      %100 = vector.multi_reduction <add>, %99, %cst_59 [1] : vector<8x32xf32> to vector<8xf32>
      %101 = vector.shape_cast %100 : vector<8xf32> to vector<8x1xf32>
      %cst_60 = arith.constant 3.200000e+01 : f32
      %102 = vector.broadcast %cst_60 : f32 to vector<8x1xf32>
      %103 = arith.divf %101, %102 : vector<8x1xf32>
      %104 = vector.broadcast %96 : vector<8x1xf32> to vector<8x32xf32>
      %105 = arith.subf %90, %104 : vector<8x32xf32>
      %cst_61 = arith.constant 9.99999974E-6 : f32
      %106 = vector.broadcast %cst_61 : f32 to vector<8x1xf32>
      %107 = arith.addf %103, %106 : vector<8x1xf32>
      %108 = math.rsqrt %107 : vector<8x1xf32>
      %109 = vector.broadcast %108 : vector<8x1xf32> to vector<8x32xf32>
      %110 = arith.mulf %105, %109 : vector<8x32xf32>
      %111 = vector.broadcast %91 : vector<1x32xf32> to vector<8x32xf32>
      %112 = arith.mulf %110, %111 : vector<8x32xf32>
      %113 = vector.broadcast %92 : vector<1x32xf32> to vector<8x32xf32>
      %114 = arith.addf %112, %113 : vector<8x32xf32>
      %115 = arith.truncf %114 : vector<8x32xf32> to vector<8x32xbf16>
      %c0_62 = arith.constant 0 : index
      %c0_63 = arith.constant 0 : index
      %116 = vector.load %arg8[%c0_62, %c0_63] : memref<32x96xbf16, #tpu.memory_space<vmem>>, vector<32x96xbf16>
      %cst_64 = arith.constant dense<0.000000e+00> : vector<8x96xf32>
      %117 = tpu.matmul %115, %116, %cst_64 {dimension_numbers = #tpu.dot_dimension_numbers<[1], [0], [0], [1], [0, 0, 1, 1], [], []>} : vector<8x32xbf16>, vector<32x96xbf16>, vector<8x96xf32> -> vector<8x96xf32>
      %118 = vector.extract_strided_slice %117 {offsets = [0, 0], sizes = [8, 8], strides = [1, 1]} : vector<8x96xf32> to vector<8x8xf32>
      %cst_65 = arith.constant 0.353553385 : f32
      %119 = vector.broadcast %cst_65 : f32 to vector<8x8xf32>
      %120 = arith.mulf %118, %119 : vector<8x8xf32>
      %121 = arith.truncf %120 : vector<8x8xf32> to vector<8x8xbf16>
      %c0_66 = arith.constant 0 : index
      %c0_67 = arith.constant 0 : index
      %c0_68 = arith.constant 0 : index
      %122 = vector.load %arg15[%c0_66, %c0_67, %c0_68] : memref<4x8x8xbf16, #tpu.memory_space<vmem>>, vector<1x8x8xbf16>
      %123 = vector.shape_cast %122 : vector<1x8x8xbf16> to vector<8x8xbf16>
      %124 = vector.shape_cast %121 : vector<8x8xbf16> to vector<1x8x8xbf16>
      tpu.vector_store %arg15[%c0_66, %c0_67, %c0_68], %124 {strides = array<i32>} : memref<4x8x8xbf16, #tpu.memory_space<vmem>>, vector<1x8x8xbf16>,
      %125 = vector.extract_strided_slice %117 {offsets = [0, 32], sizes = [8, 8], strides = [1, 1]} : vector<8x96xf32> to vector<8x8xf32>
      %126 = arith.truncf %125 : vector<8x8xf32> to vector<8x8xbf16>
      %c0_69 = arith.constant 0 : index
      %c0_70 = arith.constant 0 : index
      %c0_71 = arith.constant 0 : index
      %127 = vector.load %arg16[%c0_69, %c0_70, %c0_71] : memref<4x8x8xbf16, #tpu.memory_space<vmem>>, vector<1x8x8xbf16>
      %128 = vector.shape_cast %127 : vector<1x8x8xbf16> to vector<8x8xbf16>
      %129 = vector.shape_cast %126 : vector<8x8xbf16> to vector<1x8x8xbf16>
      tpu.vector_store %arg16[%c0_69, %c0_70, %c0_71], %129 {strides = array<i32>} : memref<4x8x8xbf16, #tpu.memory_space<vmem>>, vector<1x8x8xbf16>,
      %130 = vector.extract_strided_slice %117 {offsets = [0, 64], sizes = [8, 8], strides = [1, 1]} : vector<8x96xf32> to vector<8x8xf32>
      %131 = arith.truncf %130 : vector<8x8xf32> to vector<8x8xbf16>
      %c0_72 = arith.constant 0 : index
      %c0_73 = arith.constant 0 : index
      %c0_74 = arith.constant 0 : index
      %132 = vector.load %arg17[%c0_72, %c0_73, %c0_74] : memref<4x8x8xbf16, #tpu.memory_space<vmem>>, vector<1x8x8xbf16>
      %133 = vector.shape_cast %132 : vector<1x8x8xbf16> to vector<8x8xbf16>
      %134 = vector.shape_cast %131 : vector<8x8xbf16> to vector<1x8x8xbf16>
      tpu.vector_store %arg17[%c0_72, %c0_73, %c0_74], %134 {strides = array<i32>} : memref<4x8x8xbf16, #tpu.memory_space<vmem>>, vector<1x8x8xbf16>,
      %135 = vector.extract_strided_slice %117 {offsets = [0, 8], sizes = [8, 8], strides = [1, 1]} : vector<8x96xf32> to vector<8x8xf32>
      %cst_75 = arith.constant 0.353553385 : f32
      %136 = vector.broadcast %cst_75 : f32 to vector<8x8xf32>
      %137 = arith.mulf %135, %136 : vector<8x8xf32>
      %138 = arith.truncf %137 : vector<8x8xf32> to vector<8x8xbf16>
      %c1 = arith.constant 1 : index
      %c0_76 = arith.constant 0 : index
      %c0_77 = arith.constant 0 : index
      %139 = vector.load %arg15[%c1, %c0_76, %c0_77] : memref<4x8x8xbf16, #tpu.memory_space<vmem>>, vector<1x8x8xbf16>
      %140 = vector.shape_cast %139 : vector<1x8x8xbf16> to vector<8x8xbf16>
      %141 = vector.shape_cast %138 : vector<8x8xbf16> to vector<1x8x8xbf16>
      tpu.vector_store %arg15[%c1, %c0_76, %c0_77], %141 {strides = array<i32>} : memref<4x8x8xbf16, #tpu.memory_space<vmem>>, vector<1x8x8xbf16>,
      %142 = vector.extract_strided_slice %117 {offsets = [0, 40], sizes = [8, 8], strides = [1, 1]} : vector<8x96xf32> to vector<8x8xf32>
      %143 = arith.truncf %142 : vector<8x8xf32> to vector<8x8xbf16>
      %c1_78 = arith.constant 1 : index
      %c0_79 = arith.constant 0 : index
      %c0_80 = arith.constant 0 : index
      %144 = vector.load %arg16[%c1_78, %c0_79, %c0_80] : memref<4x8x8xbf16, #tpu.memory_space<vmem>>, vector<1x8x8xbf16>
      %145 = vector.shape_cast %144 : vector<1x8x8xbf16> to vector<8x8xbf16>
      %146 = vector.shape_cast %143 : vector<8x8xbf16> to vector<1x8x8xbf16>
      tpu.vector_store %arg16[%c1_78, %c0_79, %c0_80], %146 {strides = array<i32>} : memref<4x8x8xbf16, #tpu.memory_space<vmem>>, vector<1x8x8xbf16>,
      %147 = vector.extract_strided_slice %117 {offsets = [0, 72], sizes = [8, 8], strides = [1, 1]} : vector<8x96xf32> to vector<8x8xf32>
      %148 = arith.truncf %147 : vector<8x8xf32> to vector<8x8xbf16>
      %c1_81 = arith.constant 1 : index
      %c0_82 = arith.constant 0 : index
      %c0_83 = arith.constant 0 : index
      %149 = vector.load %arg17[%c1_81, %c0_82, %c0_83] : memref<4x8x8xbf16, #tpu.memory_space<vmem>>, vector<1x8x8xbf16>
      %150 = vector.shape_cast %149 : vector<1x8x8xbf16> to vector<8x8xbf16>
      %151 = vector.shape_cast %148 : vector<8x8xbf16> to vector<1x8x8xbf16>
      tpu.vector_store %arg17[%c1_81, %c0_82, %c0_83], %151 {strides = array<i32>} : memref<4x8x8xbf16, #tpu.memory_space<vmem>>, vector<1x8x8xbf16>,
      %152 = vector.extract_strided_slice %117 {offsets = [0, 16], sizes = [8, 8], strides = [1, 1]} : vector<8x96xf32> to vector<8x8xf32>
      %cst_84 = arith.constant 0.353553385 : f32
      %153 = vector.broadcast %cst_84 : f32 to vector<8x8xf32>
      %154 = arith.mulf %152, %153 : vector<8x8xf32>
      %155 = arith.truncf %154 : vector<8x8xf32> to vector<8x8xbf16>
      %c2 = arith.constant 2 : index
      %c0_85 = arith.constant 0 : index
      %c0_86 = arith.constant 0 : index
      %156 = vector.load %arg15[%c2, %c0_85, %c0_86] : memref<4x8x8xbf16, #tpu.memory_space<vmem>>, vector<1x8x8xbf16>
      %157 = vector.shape_cast %156 : vector<1x8x8xbf16> to vector<8x8xbf16>
      %158 = vector.shape_cast %155 : vector<8x8xbf16> to vector<1x8x8xbf16>
      tpu.vector_store %arg15[%c2, %c0_85, %c0_86], %158 {strides = array<i32>} : memref<4x8x8xbf16, #tpu.memory_space<vmem>>, vector<1x8x8xbf16>,
      %159 = vector.extract_strided_slice %117 {offsets = [0, 48], sizes = [8, 8], strides = [1, 1]} : vector<8x96xf32> to vector<8x8xf32>
      %160 = arith.truncf %159 : vector<8x8xf32> to vector<8x8xbf16>
      %c2_87 = arith.constant 2 : index
      %c0_88 = arith.constant 0 : index
      %c0_89 = arith.constant 0 : index
      %161 = vector.load %arg16[%c2_87, %c0_88, %c0_89] : memref<4x8x8xbf16, #tpu.memory_space<vmem>>, vector<1x8x8xbf16>
      %162 = vector.shape_cast %161 : vector<1x8x8xbf16> to vector<8x8xbf16>
      %163 = vector.shape_cast %160 : vector<8x8xbf16> to vector<1x8x8xbf16>
      tpu.vector_store %arg16[%c2_87, %c0_88, %c0_89], %163 {strides = array<i32>} : memref<4x8x8xbf16, #tpu.memory_space<vmem>>, vector<1x8x8xbf16>,
      %164 = vector.extract_strided_slice %117 {offsets = [0, 80], sizes = [8, 8], strides = [1, 1]} : vector<8x96xf32> to vector<8x8xf32>
      %165 = arith.truncf %164 : vector<8x8xf32> to vector<8x8xbf16>
      %c2_90 = arith.constant 2 : index
      %c0_91 = arith.constant 0 : index
      %c0_92 = arith.constant 0 : index
      %166 = vector.load %arg17[%c2_90, %c0_91, %c0_92] : memref<4x8x8xbf16, #tpu.memory_space<vmem>>, vector<1x8x8xbf16>
      %167 = vector.shape_cast %166 : vector<1x8x8xbf16> to vector<8x8xbf16>
      %168 = vector.shape_cast %165 : vector<8x8xbf16> to vector<1x8x8xbf16>
      tpu.vector_store %arg17[%c2_90, %c0_91, %c0_92], %168 {strides = array<i32>} : memref<4x8x8xbf16, #tpu.memory_space<vmem>>, vector<1x8x8xbf16>,
      %169 = vector.extract_strided_slice %117 {offsets = [0, 24], sizes = [8, 8], strides = [1, 1]} : vector<8x96xf32> to vector<8x8xf32>
      %cst_93 = arith.constant 0.353553385 : f32
      %170 = vector.broadcast %cst_93 : f32 to vector<8x8xf32>
      %171 = arith.mulf %169, %170 : vector<8x8xf32>
      %172 = arith.truncf %171 : vector<8x8xf32> to vector<8x8xbf16>
      %c3 = arith.constant 3 : index
      %c0_94 = arith.constant 0 : index
      %c0_95 = arith.constant 0 : index
      %173 = vector.load %arg15[%c3, %c0_94, %c0_95] : memref<4x8x8xbf16, #tpu.memory_space<vmem>>, vector<1x8x8xbf16>
      %174 = vector.shape_cast %173 : vector<1x8x8xbf16> to vector<8x8xbf16>
      %175 = vector.shape_cast %172 : vector<8x8xbf16> to vector<1x8x8xbf16>
      tpu.vector_store %arg15[%c3, %c0_94, %c0_95], %175 {strides = array<i32>} : memref<4x8x8xbf16, #tpu.memory_space<vmem>>, vector<1x8x8xbf16>,
      %176 = vector.extract_strided_slice %117 {offsets = [0, 56], sizes = [8, 8], strides = [1, 1]} : vector<8x96xf32> to vector<8x8xf32>
      %177 = arith.truncf %176 : vector<8x8xf32> to vector<8x8xbf16>
      %c3_96 = arith.constant 3 : index
      %c0_97 = arith.constant 0 : index
      %c0_98 = arith.constant 0 : index
      %178 = vector.load %arg16[%c3_96, %c0_97, %c0_98] : memref<4x8x8xbf16, #tpu.memory_space<vmem>>, vector<1x8x8xbf16>
      %179 = vector.shape_cast %178 : vector<1x8x8xbf16> to vector<8x8xbf16>
      %180 = vector.shape_cast %177 : vector<8x8xbf16> to vector<1x8x8xbf16>
      tpu.vector_store %arg16[%c3_96, %c0_97, %c0_98], %180 {strides = array<i32>} : memref<4x8x8xbf16, #tpu.memory_space<vmem>>, vector<1x8x8xbf16>,
      %181 = vector.extract_strided_slice %117 {offsets = [0, 88], sizes = [8, 8], strides = [1, 1]} : vector<8x96xf32> to vector<8x8xf32>
      %182 = arith.truncf %181 : vector<8x8xf32> to vector<8x8xbf16>
      %c3_99 = arith.constant 3 : index
      %c0_100 = arith.constant 0 : index
      %c0_101 = arith.constant 0 : index
      %183 = vector.load %arg17[%c3_99, %c0_100, %c0_101] : memref<4x8x8xbf16, #tpu.memory_space<vmem>>, vector<1x8x8xbf16>
      %184 = vector.shape_cast %183 : vector<1x8x8xbf16> to vector<8x8xbf16>
      %185 = vector.shape_cast %182 : vector<8x8xbf16> to vector<1x8x8xbf16>
      tpu.vector_store %arg17[%c3_99, %c0_100, %c0_101], %185 {strides = array<i32>} : memref<4x8x8xbf16, #tpu.memory_space<vmem>>, vector<1x8x8xbf16>,
    } else {
    }
    %c0 = arith.constant 0 : index
    %c0_1 = arith.constant 0 : index
    %c0_2 = arith.constant 0 : index
    %3 = vector.load %arg15[%c0, %c0_1, %c0_2] : memref<4x8x8xbf16, #tpu.memory_space<vmem>>, vector<4x8x8xbf16>
    %c0_3 = arith.constant 0 : index
    %c0_4 = arith.constant 0 : index
    %c0_5 = arith.constant 0 : index
    %4 = vector.load %arg16[%c0_3, %c0_4, %c0_5] : memref<4x8x8xbf16, #tpu.memory_space<vmem>>, vector<4x8x8xbf16>
    %c0_6 = arith.constant 0 : index
    %c0_7 = arith.constant 0 : index
    %c0_8 = arith.constant 0 : index
    %5 = vector.load %arg17[%c0_6, %c0_7, %c0_8] : memref<4x8x8xbf16, #tpu.memory_space<vmem>>, vector<4x8x8xbf16>
    "tpu.trace_start"() <{level = 10 : i32, message = "hqd,hkd->hqk"}> : () -> ()
    %cst = arith.constant dense<0.000000e+00> : vector<4x8x8xf32>
    %6 = tpu.matmul %3, %4, %cst {dimension_numbers = #tpu.dot_dimension_numbers<[2], [2], [1], [1], [0, 0, 0, 1, 1, 1], [0], [0]>} : vector<4x8x8xbf16>, vector<4x8x8xbf16>, vector<4x8x8xf32> -> vector<4x8x8xf32>
    "tpu.trace_stop"() : () -> ()
    %cst_9 = arith.constant dense<0xFF800000> : vector<4x8xf32>
    %7 = vector.multi_reduction <maximumf>, %6, %cst_9 [2] : vector<4x8x8xf32> to vector<4x8xf32>
    %8 = vector.shape_cast %7 : vector<4x8xf32> to vector<4x8x1xf32>
    %9 = vector.broadcast %8 : vector<4x8x1xf32> to vector<4x8x8xf32>
    %10 = arith.subf %6, %9 : vector<4x8x8xf32>
    %11 = math.exp %10 : vector<4x8x8xf32>
    %cst_10 = arith.constant dense<0.000000e+00> : vector<4x8xf32>
    %12 = vector.multi_reduction <add>, %11, %cst_10 [2] : vector<4x8x8xf32> to vector<4x8xf32>
    %13 = vector.shape_cast %12 : vector<4x8xf32> to vector<4x8x1xf32>
    %14 = tpu.reciprocal %13 {approx = true} : vector<4x8x1xf32> -> vector<4x8x1xf32>
    %15 = vector.broadcast %14 : vector<4x8x1xf32> to vector<4x8x8xf32>
    %16 = arith.mulf %11, %15 : vector<4x8x8xf32>
    %17 = arith.truncf %16 : vector<4x8x8xf32> to vector<4x8x8xbf16>
    "tpu.trace_start"() <{level = 10 : i32, message = "hqk,hkd->hqd"}> : () -> ()
    %cst_11 = arith.constant dense<0.000000e+00> : vector<4x8x8xf32>
    %18 = tpu.matmul %17, %5, %cst_11 {dimension_numbers = #tpu.dot_dimension_numbers<[2], [1], [1], [2], [0, 0, 0, 1, 1, 2], [0], [0]>} : vector<4x8x8xbf16>, vector<4x8x8xbf16>, vector<4x8x8xf32> -> vector<4x8x8xf32>
    "tpu.trace_stop"() : () -> ()
    %19 = vector.extract_strided_slice %18 {offsets = [0, 0, 0], sizes = [1, 8, 8], strides = [1, 1, 1]} : vector<4x8x8xf32> to vector<1x8x8xf32>
    %20 = vector.shape_cast %19 : vector<1x8x8xf32> to vector<8x8xf32>
    %21 = arith.truncf %20 : vector<8x8xf32> to vector<8x8xbf16>
    %c0_12 = arith.constant 0 : index
    %c0_13 = arith.constant 0 : index
    %22 = vector.load %arg18[%c0_12, %c0_13] : memref<8x32xbf16, #tpu.memory_space<vmem>>, vector<8x8xbf16>
    tpu.vector_store %arg18[%c0_12, %c0_13], %21 {strides = array<i32>} : memref<8x32xbf16, #tpu.memory_space<vmem>>, vector<8x8xbf16>,
    %23 = vector.extract_strided_slice %18 {offsets = [1, 0, 0], sizes = [1, 8, 8], strides = [1, 1, 1]} : vector<4x8x8xf32> to vector<1x8x8xf32>
    %24 = vector.shape_cast %23 : vector<1x8x8xf32> to vector<8x8xf32>
    %25 = arith.truncf %24 : vector<8x8xf32> to vector<8x8xbf16>
    %c0_14 = arith.constant 0 : index
    %c8 = arith.constant 8 : index
    %26 = vector.load %arg18[%c0_14, %c8] : memref<8x32xbf16, #tpu.memory_space<vmem>>, vector<8x8xbf16>
    tpu.vector_store %arg18[%c0_14, %c8], %25 {strides = array<i32>} : memref<8x32xbf16, #tpu.memory_space<vmem>>, vector<8x8xbf16>,
    %27 = vector.extract_strided_slice %18 {offsets = [2, 0, 0], sizes = [1, 8, 8], strides = [1, 1, 1]} : vector<4x8x8xf32> to vector<1x8x8xf32>
    %28 = vector.shape_cast %27 : vector<1x8x8xf32> to vector<8x8xf32>
    %29 = arith.truncf %28 : vector<8x8xf32> to vector<8x8xbf16>
    %c0_15 = arith.constant 0 : index
    %c16 = arith.constant 16 : index
    %30 = vector.load %arg18[%c0_15, %c16] : memref<8x32xbf16, #tpu.memory_space<vmem>>, vector<8x8xbf16>
    tpu.vector_store %arg18[%c0_15, %c16], %29 {strides = array<i32>} : memref<8x32xbf16, #tpu.memory_space<vmem>>, vector<8x8xbf16>,
    %31 = vector.extract_strided_slice %18 {offsets = [3, 0, 0], sizes = [1, 8, 8], strides = [1, 1, 1]} : vector<4x8x8xf32> to vector<1x8x8xf32>
    %32 = vector.shape_cast %31 : vector<1x8x8xf32> to vector<8x8xf32>
    %33 = arith.truncf %32 : vector<8x8xf32> to vector<8x8xbf16>
    %c0_16 = arith.constant 0 : index
    %c24 = arith.constant 24 : index
    %34 = vector.load %arg18[%c0_16, %c24] : memref<8x32xbf16, #tpu.memory_space<vmem>>, vector<8x8xbf16>
    tpu.vector_store %arg18[%c0_16, %c24], %33 {strides = array<i32>} : memref<8x32xbf16, #tpu.memory_space<vmem>>, vector<8x8xbf16>,
    %c0_17 = arith.constant 0 : index
    %c0_18 = arith.constant 0 : index
    %35 = vector.load %arg18[%c0_17, %c0_18] : memref<8x32xbf16, #tpu.memory_space<vmem>>, vector<8x32xbf16>
    %c0_19 = arith.constant 0 : index
    %c0_20 = arith.constant 0 : index
    %36 = vector.load %arg9[%c0_19, %c0_20] : memref<32x32xbf16, #tpu.memory_space<vmem>>, vector<32x32xbf16>
    %cst_21 = arith.constant dense<0.000000e+00> : vector<8x32xf32>
    %37 = tpu.matmul %35, %36, %cst_21 {dimension_numbers = #tpu.dot_dimension_numbers<[1], [0], [0], [1], [0, 0, 1, 1], [], []>} : vector<8x32xbf16>, vector<32x32xbf16>, vector<8x32xf32> -> vector<8x32xf32>
    %c0_22 = arith.constant 0 : index
    %c0_23 = arith.constant 0 : index
    %c0_24 = arith.constant 0 : index
    %38 = vector.load %arg3[%c0_22, %c0_23, %c0_24] : memref<1x8x32xf32, #tpu.memory_space<vmem>>, vector<1x8x32xf32>
    %39 = vector.shape_cast %38 : vector<1x8x32xf32> to vector<8x32xf32>
    %40 = arith.addf %39, %37 : vector<8x32xf32>
    %c0_25 = arith.constant 0 : index
    %c0_26 = arith.constant 0 : index
    %41 = vector.load %arg6[%c0_25, %c0_26] : memref<1x32xf32, #tpu.memory_space<vmem>>, vector<1x32xf32>
    %c0_27 = arith.constant 0 : index
    %c0_28 = arith.constant 0 : index
    %42 = vector.load %arg7[%c0_27, %c0_28] : memref<1x32xf32, #tpu.memory_space<vmem>>, vector<1x32xf32>
    %cst_29 = arith.constant dense<0.000000e+00> : vector<8xf32>
    %43 = vector.multi_reduction <add>, %40, %cst_29 [1] : vector<8x32xf32> to vector<8xf32>
    %44 = vector.shape_cast %43 : vector<8xf32> to vector<8x1xf32>
    %cst_30 = arith.constant 3.200000e+01 : f32
    %45 = vector.broadcast %cst_30 : f32 to vector<8x1xf32>
    %46 = arith.divf %44, %45 : vector<8x1xf32>
    %47 = vector.broadcast %46 : vector<8x1xf32> to vector<8x32xf32>
    %48 = arith.subf %40, %47 : vector<8x32xf32>
    %49 = arith.mulf %48, %48 : vector<8x32xf32>
    %cst_31 = arith.constant dense<0.000000e+00> : vector<8xf32>
    %50 = vector.multi_reduction <add>, %49, %cst_31 [1] : vector<8x32xf32> to vector<8xf32>
    %51 = vector.shape_cast %50 : vector<8xf32> to vector<8x1xf32>
    %cst_32 = arith.constant 3.200000e+01 : f32
    %52 = vector.broadcast %cst_32 : f32 to vector<8x1xf32>
    %53 = arith.divf %51, %52 : vector<8x1xf32>
    %54 = vector.broadcast %46 : vector<8x1xf32> to vector<8x32xf32>
    %55 = arith.subf %40, %54 : vector<8x32xf32>
    %cst_33 = arith.constant 9.99999974E-6 : f32
    %56 = vector.broadcast %cst_33 : f32 to vector<8x1xf32>
    %57 = arith.addf %53, %56 : vector<8x1xf32>
    %58 = math.rsqrt %57 : vector<8x1xf32>
    %59 = vector.broadcast %58 : vector<8x1xf32> to vector<8x32xf32>
    %60 = arith.mulf %55, %59 : vector<8x32xf32>
    %61 = vector.broadcast %41 : vector<1x32xf32> to vector<8x32xf32>
    %62 = arith.mulf %60, %61 : vector<8x32xf32>
    %63 = vector.broadcast %42 : vector<1x32xf32> to vector<8x32xf32>
    %64 = arith.addf %62, %63 : vector<8x32xf32>
    %65 = arith.truncf %64 : vector<8x32xf32> to vector<8x32xbf16>
    %c0_34 = arith.constant 0 : index
    %c0_35 = arith.constant 0 : index
    %66 = vector.load %arg10[%c0_34, %c0_35] : memref<32x64xbf16, #tpu.memory_space<vmem>>, vector<32x64xbf16>
    %cst_36 = arith.constant dense<0.000000e+00> : vector<8x64xf32>
    %67 = tpu.matmul %65, %66, %cst_36 {dimension_numbers = #tpu.dot_dimension_numbers<[1], [0], [0], [1], [0, 0, 1, 1], [], []>} : vector<8x32xbf16>, vector<32x64xbf16>, vector<8x64xf32> -> vector<8x64xf32>
    %c0_37 = arith.constant 0 : index
    %c0_38 = arith.constant 0 : index
    %68 = vector.load %arg11[%c0_37, %c0_38] : memref<1x64xf32, #tpu.memory_space<vmem>>, vector<1x64xf32>
    %69 = vector.broadcast %68 : vector<1x64xf32> to vector<8x64xf32>
    %70 = arith.addf %67, %69 : vector<8x64xf32>
    %cst_39 = arith.constant 5.000000e-01 : f32
    %71 = vector.broadcast %cst_39 : f32 to vector<8x64xf32>
    %72 = arith.mulf %71, %70 : vector<8x64xf32>
    %cst_40 = arith.constant 0.707106769 : f32
    %73 = vector.broadcast %cst_40 : f32 to vector<8x64xf32>
    %74 = arith.mulf %70, %73 : vector<8x64xf32>
    %75 = math.erf %74 : vector<8x64xf32>
    %cst_41 = arith.constant 1.000000e+00 : f32
    %76 = vector.broadcast %cst_41 : f32 to vector<8x64xf32>
    %77 = arith.addf %76, %75 : vector<8x64xf32>
    %78 = arith.mulf %72, %77 : vector<8x64xf32>
    %79 = arith.truncf %78 : vector<8x64xf32> to vector<8x64xbf16>
    %c0_42 = arith.constant 0 : index
    %c0_43 = arith.constant 0 : index
    %80 = vector.load %arg12[%c0_42, %c0_43] : memref<64x32xbf16, #tpu.memory_space<vmem>>, vector<64x32xbf16>
    %cst_44 = arith.constant dense<0.000000e+00> : vector<8x32xf32>
    %81 = tpu.matmul %79, %80, %cst_44 {dimension_numbers = #tpu.dot_dimension_numbers<[1], [0], [0], [1], [0, 0, 1, 1], [], []>} : vector<8x64xbf16>, vector<64x32xbf16>, vector<8x32xf32> -> vector<8x32xf32>
    %c0_45 = arith.constant 0 : index
    %c0_46 = arith.constant 0 : index
    %82 = vector.load %arg13[%c0_45, %c0_46] : memref<1x32xf32, #tpu.memory_space<vmem>>, vector<1x32xf32>
    %83 = vector.broadcast %82 : vector<1x32xf32> to vector<8x32xf32>
    %84 = arith.addf %81, %83 : vector<8x32xf32>
    %85 = arith.addf %40, %84 : vector<8x32xf32>
    %c0_47 = arith.constant 0 : index
    %c0_48 = arith.constant 0 : index
    %c0_49 = arith.constant 0 : index
    %86 = vector.load %arg14[%c0_47, %c0_48, %c0_49] : memref<1x8x32xf32, #tpu.memory_space<vmem>>, vector<1x8x32xf32>
    %87 = vector.shape_cast %86 : vector<1x8x32xf32> to vector<8x32xf32>
    %88 = vector.shape_cast %85 : vector<8x32xf32> to vector<1x8x32xf32>
    tpu.vector_store %arg14[%c0_47, %c0_48, %c0_49], %88 {strides = array<i32>} : memref<1x8x32xf32, #tpu.memory_space<vmem>>, vector<1x8x32xf32>,
    return
  }
  func.func @transform_0(%arg0: i32, %arg1: i32) -> (i32, i32, i32) {
    %c0_i32 = arith.constant 0 : i32
    %c0_i32_0 = arith.constant 0 : i32
    %c0_i32_1 = arith.constant 0 : i32
    return %arg0, %c0_i32, %c0_i32_0 : i32, i32, i32
  }
  func.func @transform_1(%arg0: i32, %arg1: i32) -> (i32, i32, i32) {
    %c0_i32 = arith.constant 0 : i32
    %c0_i32_0 = arith.constant 0 : i32
    return %arg0, %arg1, %c0_i32 : i32, i32, i32
  }
  func.func @transform_2(%arg0: i32, %arg1: i32) -> (i32, i32) {
    %c0_i32 = arith.constant 0 : i32
    %c0_i32_0 = arith.constant 0 : i32
    %c0_i32_1 = arith.constant 0 : i32
    return %c0_i32, %c0_i32_0 : i32, i32
  }
  func.func @transform_3(%arg0: i32, %arg1: i32) -> (i32, i32) {
    %c0_i32 = arith.constant 0 : i32
    %c0_i32_0 = arith.constant 0 : i32
    %c0_i32_1 = arith.constant 0 : i32
    return %c0_i32, %c0_i32_0 : i32, i32
  }
  func.func @transform_4(%arg0: i32, %arg1: i32) -> (i32, i32) {
    %c0_i32 = arith.constant 0 : i32
    %c0_i32_0 = arith.constant 0 : i32
    %c0_i32_1 = arith.constant 0 : i32
    return %c0_i32, %c0_i32_0 : i32, i32
  }
  func.func @transform_5(%arg0: i32, %arg1: i32) -> (i32, i32) {
    %c0_i32 = arith.constant 0 : i32
    %c0_i32_0 = arith.constant 0 : i32
    %c0_i32_1 = arith.constant 0 : i32
    return %c0_i32, %c0_i32_0 : i32, i32
  }
  func.func @transform_6(%arg0: i32, %arg1: i32) -> (i32, i32) {
    %c0_i32 = arith.constant 0 : i32
    %c0_i32_0 = arith.constant 0 : i32
    %c0_i32_1 = arith.constant 0 : i32
    return %c0_i32, %c0_i32_0 : i32, i32
  }
  func.func @transform_7(%arg0: i32, %arg1: i32) -> (i32, i32) {
    %c0_i32 = arith.constant 0 : i32
    %c0_i32_0 = arith.constant 0 : i32
    %c0_i32_1 = arith.constant 0 : i32
    return %c0_i32, %c0_i32_0 : i32, i32
  }
  func.func @transform_8(%arg0: i32, %arg1: i32) -> (i32, i32) {
    %c0_i32 = arith.constant 0 : i32
    %c0_i32_0 = arith.constant 0 : i32
    %c0_i32_1 = arith.constant 0 : i32
    return %c0_i32, %c0_i32_0 : i32, i32
  }
  func.func @transform_9(%arg0: i32, %arg1: i32) -> (i32, i32) {
    %c0_i32 = arith.constant 0 : i32
    %c0_i32_0 = arith.constant 0 : i32
    %c0_i32_1 = arith.constant 0 : i32
    return %c0_i32, %c0_i32_0 : i32, i32
  }
  func.func @transform_10(%arg0: i32, %arg1: i32) -> (i32, i32) {
    %c0_i32 = arith.constant 0 : i32
    %c0_i32_0 = arith.constant 0 : i32
    %c0_i32_1 = arith.constant 0 : i32
    return %c0_i32, %c0_i32_0 : i32, i32
  }
  func.func @transform_11(%arg0: i32, %arg1: i32) -> (i32, i32) {
    %c0_i32 = arith.constant 0 : i32
    %c0_i32_0 = arith.constant 0 : i32
    %c0_i32_1 = arith.constant 0 : i32
    return %c0_i32, %c0_i32_0 : i32, i32
  }
  func.func @transform_12(%arg0: i32, %arg1: i32) -> (i32, i32, i32) {
    %c0_i32 = arith.constant 0 : i32
    %c0_i32_0 = arith.constant 0 : i32
    return %arg0, %arg1, %c0_i32 : i32, i32, i32
  }
}

module attributes {stable_mosaic.version = 11 : i64} {
  func.func @block_kernel(%arg0: i32, %arg1: i32, %arg2: memref<1x8x32xf32, #tpu.memory_space<vmem>>, %arg3: memref<1x8x32xf32, #tpu.memory_space<vmem>>, %arg4: memref<1x32xf32, #tpu.memory_space<vmem>>, %arg5: memref<1x32xf32, #tpu.memory_space<vmem>>, %arg6: memref<1x32xf32, #tpu.memory_space<vmem>>, %arg7: memref<1x32xf32, #tpu.memory_space<vmem>>, %arg8: memref<32x96xbf16, #tpu.memory_space<vmem>>, %arg9: memref<32x32xbf16, #tpu.memory_space<vmem>>, %arg10: memref<32x64xbf16, #tpu.memory_space<vmem>>, %arg11: memref<1x64xf32, #tpu.memory_space<vmem>>, %arg12: memref<64x32xbf16, #tpu.memory_space<vmem>>, %arg13: memref<1x32xf32, #tpu.memory_space<vmem>>, %arg14: memref<1x8x32xf32, #tpu.memory_space<vmem>>, %arg15: memref<4x8x8xbf16, #tpu.memory_space<vmem>>, %arg16: memref<4x8x8xbf16, #tpu.memory_space<vmem>>, %arg17: memref<4x8x8xbf16, #tpu.memory_space<vmem>>, %arg18: memref<8x32xbf16, #tpu.memory_space<vmem>>) attributes {dimension_semantics = [#tpu.dimension_semantics<parallel>, #tpu.dimension_semantics<arbitrary>], iteration_bounds = array<i64: 2, 1>, scalar_prefetch = 0 : i64, scratch_operands = 4 : i64, tpu.core_type = #tpu.core_type<tc>, window_params = [{transform_indices = @transform_0, window_bounds = array<i64: 1, 8, 32>}, {transform_indices = @transform_1, window_bounds = array<i64: 1, 8, 32>}, {pipeline_mode = #tpu.pipeline_mode<synchronous>, transform_indices = @transform_2, window_bounds = array<i64: 1, 32>}, {pipeline_mode = #tpu.pipeline_mode<synchronous>, transform_indices = @transform_3, window_bounds = array<i64: 1, 32>}, {pipeline_mode = #tpu.pipeline_mode<synchronous>, transform_indices = @transform_4, window_bounds = array<i64: 1, 32>}, {pipeline_mode = #tpu.pipeline_mode<synchronous>, transform_indices = @transform_5, window_bounds = array<i64: 1, 32>}, {pipeline_mode = #tpu.pipeline_mode<synchronous>, transform_indices = @transform_6, window_bounds = array<i64: 32, 96>}, {pipeline_mode = #tpu.pipeline_mode<synchronous>, transform_indices = @transform_7, window_bounds = array<i64: 32, 32>}, {pipeline_mode = #tpu.pipeline_mode<synchronous>, transform_indices = @transform_8, window_bounds = array<i64: 32, 64>}, {pipeline_mode = #tpu.pipeline_mode<synchronous>, transform_indices = @transform_9, window_bounds = array<i64: 1, 64>}, {pipeline_mode = #tpu.pipeline_mode<synchronous>, transform_indices = @transform_10, window_bounds = array<i64: 64, 32>}, {pipeline_mode = #tpu.pipeline_mode<synchronous>, transform_indices = @transform_11, window_bounds = array<i64: 1, 32>}, {transform_indices = @transform_12, window_bounds = array<i64: 1, 8, 32>}]} {
    %c0_i32 = arith.constant 0 : i32
    %0 = arith.cmpi eq, %arg1, %c0_i32 : i32
    %1 = arith.extui %0 : i1 to i32
    %c0_i32_0 = arith.constant 0 : i32
    %2 = arith.cmpi ne, %1, %c0_i32_0 : i32
    scf.if %2 {
      %c0_50 = arith.constant 0 : index
      %c0_51 = arith.constant 0 : index
      %c0_52 = arith.constant 0 : index
      %89 = vector.load %arg2[%c0_50, %c0_51, %c0_52] : memref<1x8x32xf32, #tpu.memory_space<vmem>>, vector<1x8x32xf32>
      %90 = vector.shape_cast %89 : vector<1x8x32xf32> to vector<8x32xf32>
      %c0_53 = arith.constant 0 : index
      %c0_54 = arith.constant 0 : index
      %91 = vector.load %arg4[%c0_53, %c0_54] : memref<1x32xf32, #tpu.memory_space<vmem>>, vector<1x32xf32>
      %c0_55 = arith.constant 0 : index
      %c0_56 = arith.constant 0 : index
      %92 = vector.load %arg5[%c0_55, %c0_56] : memref<1x32xf32, #tpu.memory_space<vmem>>, vector<1x32xf32>
      %cst_57 = arith.constant dense<0.000000e+00> : vector<8xf32>
      %93 = vector.multi_reduction <add>, %90, %cst_57 [1] : vector<8x32xf32> to vector<8xf32>
      %94 = vector.shape_cast %93 : vector<8xf32> to vector<8x1xf32>
      %cst_58 = arith.constant 3.200000e+01 : f32
      %95 = vector.broadcast %cst_58 : f32 to vector<8x1xf32>
      %96 = arith.divf %94, %95 : vector<8x1xf32>
      %97 = vector.broadcast %96 : vector<8x1xf32> to vector<8x32xf32>
      %98 = arith.subf %90, %97 : vector<8x32xf32>
      %99 = arith.mulf %98, %98 : vector<8x32xf32>
      %cst_59 = arith.constant dense<0.000000e+00> : vector<8xf32>
      %100 = vector.multi_reduction <add>, %99, %cst_59 [1] : vector<8x32xf32> to vector<8xf32>
      %101 = vector.shape_cast %100 : vector<8xf32> to vector<8x1xf32>
      %cst_60 = arith.constant 3.200000e+01 : f32
      %102 = vector.broadcast %cst_60 : f32 to vector<8x1xf32>
      %103 = arith.divf %101, %102 : vector<8x1xf32>
      %104 = vector.broadcast %96 : vector<8x1xf32> to vector<8x32xf32>
      %105 = arith.subf %90, %104 : vector<8x32xf32>
      %cst_61 = arith.constant 9.99999974E-6 : f32
      %106 = vector.broadcast %cst_61 : f32 to vector<8x1xf32>
      %107 = arith.addf %103, %106 : vector<8x1xf32>
      %108 = math.rsqrt %107 : vector<8x1xf32>
      %109 = vector.broadcast %108 : vector<8x1xf32> to vector<8x32xf32>
      %110 = arith.mulf %105, %109 : vector<8x32xf32>
      %111 = vector.broadcast %91 : vector<1x32xf32> to vector<8x32xf32>
      %112 = arith.mulf %110, %111 : vector<8x32xf32>
      %113 = vector.broadcast %92 : vector<1x32xf32> to vector<8x32xf32>
      %114 = arith.addf %112, %113 : vector<8x32xf32>
      %115 = arith.truncf %114 : vector<8x32xf32> to vector<8x32xbf16>
      %c0_62 = arith.constant 0 : index
      %c0_63 = arith.constant 0 : index
      %116 = vector.load %arg8[%c0_62, %c0_63] : memref<32x96xbf16, #tpu.memory_space<vmem>>, vector<32x96xbf16>
      %cst_64 = arith.constant dense<0.000000e+00> : vector<8x96xf32>
      %117 = tpu.matmul %115, %116, %cst_64 {dimension_numbers = #tpu.dot_dimension_numbers<[1], [0], [0], [1], [0, 0, 1, 1], [], []>} : vector<8x32xbf16>, vector<32x96xbf16>, vector<8x96xf32> -> vector<8x96xf32>
      %118 = vector.extract_strided_slice %117 {offsets = [0, 0], sizes = [8, 8], strides = [1, 1]} : vector<8x96xf32> to vector<8x8xf32>
      %cst_65 = arith.constant 0.353553385 : f32
      %119 = vector.broadcast %cst_65 : f32 to vector<8x8xf32>
      %120 = arith.mulf %118, %119 : vector<8x8xf32>
      %121 = arith.truncf %120 : vector<8x8xf32> to vector<8x8xbf16>
      %c0_66 = arith.constant 0 : index
      %c0_67 = arith.constant 0 : index
      %c0_68 = arith.constant 0 : index
      %122 = vector.load %arg15[%c0_66, %c0_67, %c0_68] : memref<4x8x8xbf16, #tpu.memory_space<vmem>>, vector<1x8x8xbf16>
      %123 = vector.shape_cast %122 : vector<1x8x8xbf16> to vector<8x8xbf16>
      %124 = vector.shape_cast %121 : vector<8x8xbf16> to vector<1x8x8xbf16>
      tpu.vector_store %arg15[%c0_66, %c0_67, %c0_68], %124 {strides = array<i32>} : memref<4x8x8xbf16, #tpu.memory_space<vmem>>, vector<1x8x8xbf16>,
      %125 = vector.extract_strided_slice %117 {offsets = [0, 32], sizes = [8, 8], strides = [1, 1]} : vector<8x96xf32> to vector<8x8xf32>
      %126 = arith.truncf %125 : vector<8x8xf32> to vector<8x8xbf16>
      %c0_69 = arith.constant 0 : index
      %c0_70 = arith.constant 0 : index
      %c0_71 = arith.constant 0 : index
      %127 = vector.load %arg16[%c0_69, %c0_70, %c0_71] : memref<4x8x8xbf16, #tpu.memory_space<vmem>>, vector<1x8x8xbf16>
      %128 = vector.shape_cast %127 : vector<1x8x8xbf16> to vector<8x8xbf16>
      %129 = vector.shape_cast %126 : vector<8x8xbf16> to vector<1x8x8xbf16>
      tpu.vector_store %arg16[%c0_69, %c0_70, %c0_71], %129 {strides = array<i32>} : memref<4x8x8xbf16, #tpu.memory_space<vmem>>, vector<1x8x8xbf16>,
      %130 = vector.extract_strided_slice %117 {offsets = [0, 64], sizes = [8, 8], strides = [1, 1]} : vector<8x96xf32> to vector<8x8xf32>
      %131 = arith.truncf %130 : vector<8x8xf32> to vector<8x8xbf16>
      %c0_72 = arith.constant 0 : index
      %c0_73 = arith.constant 0 : index
      %c0_74 = arith.constant 0 : index
      %132 = vector.load %arg17[%c0_72, %c0_73, %c0_74] : memref<4x8x8xbf16, #tpu.memory_space<vmem>>, vector<1x8x8xbf16>
      %133 = vector.shape_cast %132 : vector<1x8x8xbf16> to vector<8x8xbf16>
      %134 = vector.shape_cast %131 : vector<8x8xbf16> to vector<1x8x8xbf16>
      tpu.vector_store %arg17[%c0_72, %c0_73, %c0_74], %134 {strides = array<i32>} : memref<4x8x8xbf16, #tpu.memory_space<vmem>>, vector<1x8x8xbf16>,
      %135 = vector.extract_strided_slice %117 {offsets = [0, 8], sizes = [8, 8], strides = [1, 1]} : vector<8x96xf32> to vector<8x8xf32>
      %cst_75 = arith.constant 0.353553385 : f32
      %136 = vector.broadcast %cst_75 : f32 to vector<8x8xf32>
      %137 = arith.mulf %135, %136 : vector<8x8xf32>
      %138 = arith.truncf %137 : vector<8x8xf32> to vector<8x8xbf16>
      %c1 = arith.constant 1 : index
      %c0_76 = arith.constant 0 : index
      %c0_77 = arith.constant 0 : index
      %139 = vector.load %arg15[%c1, %c0_76, %c0_77] : memref<4x8x8xbf16, #tpu.memory_space<vmem>>, vector<1x8x8xbf16>
      %140 = vector.shape_cast %139 : vector<1x8x8xbf16> to vector<8x8xbf16>
      %141 = vector.shape_cast %138 : vector<8x8xbf16> to vector<1x8x8xbf16>
      tpu.vector_store %arg15[%c1, %c0_76, %c0_77], %141 {strides = array<i32>} : memref<4x8x8xbf16, #tpu.memory_space<vmem>>, vector<1x8x8xbf16>,
      %142 = vector.extract_strided_slice %117 {offsets = [0, 40], sizes = [8, 8], strides = [1, 1]} : vector<8x96xf32> to vector<8x8xf32>
      %143 = arith.truncf %142 : vector<8x8xf32> to vector<8x8xbf16>
      %c1_78 = arith.constant 1 : index
      %c0_79 = arith.constant 0 : index
      %c0_80 = arith.constant 0 : index
      %144 = vector.load %arg16[%c1_78, %c0_79, %c0_80] : memref<4x8x8xbf16, #tpu.memory_space<vmem>>, vector<1x8x8xbf16>
      %145 = vector.shape_cast %144 : vector<1x8x8xbf16> to vector<8x8xbf16>
      %146 = vector.shape_cast %143 : vector<8x8xbf16> to vector<1x8x8xbf16>
      tpu.vector_store %arg16[%c1_78, %c0_79, %c0_80], %146 {strides = array<i32>} : memref<4x8x8xbf16, #tpu.memory_space<vmem>>, vector<1x8x8xbf16>,
      %147 = vector.extract_strided_slice %117 {offsets = [0, 72], sizes = [8, 8], strides = [1, 1]} : vector<8x96xf32> to vector<8x8xf32>
      %148 = arith.truncf %147 : vector<8x8xf32> to vector<8x8xbf16>
      %c1_81 = arith.constant 1 : index
      %c0_82 = arith.constant 0 : index
      %c0_83 = arith.constant 0 : index
      %149 = vector.load %arg17[%c1_81, %c0_82, %c0_83] : memref<4x8x8xbf16, #tpu.memory_space<vmem>>, vector<1x8x8xbf16>
      %150 = vector.shape_cast %149 : vector<1x8x8xbf16> to vector<8x8xbf16>
      %151 = vector.shape_cast %148 : vector<8x8xbf16> to vector<1x8x8xbf16>
      tpu.vector_store %arg17[%c1_81, %c0_82, %c0_83], %151 {strides = array<i32>} : memref<4x8x8xbf16, #tpu.memory_space<vmem>>, vector<1x8x8xbf16>,
      %152 = vector.extract_strided_slice %117 {offsets = [0, 16], sizes = [8, 8], strides = [1, 1]} : vector<8x96xf32> to vector<8x8xf32>
      %cst_84 = arith.constant 0.353553385 : f32
      %153 = vector.broadcast %cst_84 : f32 to vector<8x8xf32>
      %154 = arith.mulf %152, %153 : vector<8x8xf32>
      %155 = arith.truncf %154 : vector<8x8xf32> to vector<8x8xbf16>
      %c2 = arith.constant 2 : index
      %c0_85 = arith.constant 0 : index
      %c0_86 = arith.constant 0 : index
      %156 = vector.load %arg15[%c2, %c0_85, %c0_86] : memref<4x8x8xbf16, #tpu.memory_space<vmem>>, vector<1x8x8xbf16>
      %157 = vector.shape_cast %156 : vector<1x8x8xbf16> to vector<8x8xbf16>
      %158 = vector.shape_cast %155 : vector<8x8xbf16> to vector<1x8x8xbf16>
      tpu.vector_store %arg15[%c2, %c0_85, %c0_86], %158 {strides = array<i32>} : memref<4x8x8xbf16, #tpu.memory_space<vmem>>, vector<1x8x8xbf16>,
      %159 = vector.extract_strided_slice %117 {offsets = [0, 48], sizes = [8, 8], strides = [1, 1]} : vector<8x96xf32> to vector<8x8xf32>
      %160 = arith.truncf %159 : vector<8x8xf32> to vector<8x8xbf16>
      %c2_87 = arith.constant 2 : index
      %c0_88 = arith.constant 0 : index
      %c0_89 = arith.constant 0 : index
      %161 = vector.load %arg16[%c2_87, %c0_88, %c0_89] : memref<4x8x8xbf16, #tpu.memory_space<vmem>>, vector<1x8x8xbf16>
      %162 = vector.shape_cast %161 : vector<1x8x8xbf16> to vector<8x8xbf16>
      %163 = vector.shape_cast %160 : vector<8x8xbf16> to vector<1x8x8xbf16>
      tpu.vector_store %arg16[%c2_87, %c0_88, %c0_89], %163 {strides = array<i32>} : memref<4x8x8xbf16, #tpu.memory_space<vmem>>, vector<1x8x8xbf16>,
      %164 = vector.extract_strided_slice %117 {offsets = [0, 80], sizes = [8, 8], strides = [1, 1]} : vector<8x96xf32> to vector<8x8xf32>
      %165 = arith.truncf %164 : vector<8x8xf32> to vector<8x8xbf16>
      %c2_90 = arith.constant 2 : index
      %c0_91 = arith.constant 0 : index
      %c0_92 = arith.constant 0 : index
      %166 = vector.load %arg17[%c2_90, %c0_91, %c0_92] : memref<4x8x8xbf16, #tpu.memory_space<vmem>>, vector<1x8x8xbf16>
      %167 = vector.shape_cast %166 : vector<1x8x8xbf16> to vector<8x8xbf16>
      %168 = vector.shape_cast %165 : vector<8x8xbf16> to vector<1x8x8xbf16>
      tpu.vector_store %arg17[%c2_90, %c0_91, %c0_92], %168 {strides = array<i32>} : memref<4x8x8xbf16, #tpu.memory_space<vmem>>, vector<1x8x8xbf16>,
      %169 = vector.extract_strided_slice %117 {offsets = [0, 24], sizes = [8, 8], strides = [1, 1]} : vector<8x96xf32> to vector<8x8xf32>
      %cst_93 = arith.constant 0.353553385 : f32
      %170 = vector.broadcast %cst_93 : f32 to vector<8x8xf32>
      %171 = arith.mulf %169, %170 : vector<8x8xf32>
      %172 = arith.truncf %171 : vector<8x8xf32> to vector<8x8xbf16>
      %c3 = arith.constant 3 : index
      %c0_94 = arith.constant 0 : index
      %c0_95 = arith.constant 0 : index
      %173 = vector.load %arg15[%c3, %c0_94, %c0_95] : memref<4x8x8xbf16, #tpu.memory_space<vmem>>, vector<1x8x8xbf16>
      %174 = vector.shape_cast %173 : vector<1x8x8xbf16> to vector<8x8xbf16>
      %175 = vector.shape_cast %172 : vector<8x8xbf16> to vector<1x8x8xbf16>
      tpu.vector_store %arg15[%c3, %c0_94, %c0_95], %175 {strides = array<i32>} : memref<4x8x8xbf16, #tpu.memory_space<vmem>>, vector<1x8x8xbf16>,
      %176 = vector.extract_strided_slice %117 {offsets = [0, 56], sizes = [8, 8], strides = [1, 1]} : vector<8x96xf32> to vector<8x8xf32>
      %177 = arith.truncf %176 : vector<8x8xf32> to vector<8x8xbf16>
      %c3_96 = arith.constant 3 : index
      %c0_97 = arith.constant 0 : index
      %c0_98 = arith.constant 0 : index
      %178 = vector.load %arg16[%c3_96, %c0_97, %c0_98] : memref<4x8x8xbf16, #tpu.memory_space<vmem>>, vector<1x8x8xbf16>
      %179 = vector.shape_cast %178 : vector<1x8x8xbf16> to vector<8x8xbf16>
      %180 = vector.shape_cast %177 : vector<8x8xbf16> to vector<1x8x8xbf16>
      tpu.vector_store %arg16[%c3_96, %c0_97, %c0_98], %180 {strides = array<i32>} : memref<4x8x8xbf16, #tpu.memory_space<vmem>>, vector<1x8x8xbf16>,
      %181 = vector.extract_strided_slice %117 {offsets = [0, 88], sizes = [8, 8], strides = [1, 1]} : vector<8x96xf32> to vector<8x8xf32>
      %182 = arith.truncf %181 : vector<8x8xf32> to vector<8x8xbf16>
      %c3_99 = arith.constant 3 : index
      %c0_100 = arith.constant 0 : index
      %c0_101 = arith.constant 0 : index
      %183 = vector.load %arg17[%c3_99, %c0_100, %c0_101] : memref<4x8x8xbf16, #tpu.memory_space<vmem>>, vector<1x8x8xbf16>
      %184 = vector.shape_cast %183 : vector<1x8x8xbf16> to vector<8x8xbf16>
      %185 = vector.shape_cast %182 : vector<8x8xbf16> to vector<1x8x8xbf16>
      tpu.vector_store %arg17[%c3_99, %c0_100, %c0_101], %185 {strides = array<i32>} : memref<4x8x8xbf16, #tpu.memory_space<vmem>>, vector<1x8x8xbf16>,
    } else {
    }
    %c0 = arith.constant 0 : index
    %c0_1 = arith.constant 0 : index
    %c0_2 = arith.constant 0 : index
    %3 = vector.load %arg15[%c0, %c0_1, %c0_2] : memref<4x8x8xbf16, #tpu.memory_space<vmem>>, vector<4x8x8xbf16>
    %c0_3 = arith.constant 0 : index
    %c0_4 = arith.constant 0 : index
    %c0_5 = arith.constant 0 : index
    %4 = vector.load %arg16[%c0_3, %c0_4, %c0_5] : memref<4x8x8xbf16, #tpu.memory_space<vmem>>, vector<4x8x8xbf16>
    %c0_6 = arith.constant 0 : index
    %c0_7 = arith.constant 0 : index
    %c0_8 = arith.constant 0 : index
    %5 = vector.load %arg17[%c0_6, %c0_7, %c0_8] : memref<4x8x8xbf16, #tpu.memory_space<vmem>>, vector<4x8x8xbf16>
    "tpu.trace_start"() <{level = 10 : i32, message = "hqd,hkd->hqk"}> : () -> ()
    %cst = arith.constant dense<0.000000e+00> : vector<4x8x8xf32>
    %6 = tpu.matmul %3, %4, %cst {dimension_numbers = #tpu.dot_dimension_numbers<[2], [2], [1], [1], [0, 0, 0, 1, 1, 1], [0], [0]>} : vector<4x8x8xbf16>, vector<4x8x8xbf16>, vector<4x8x8xf32> -> vector<4x8x8xf32>
    "tpu.trace_stop"() : () -> ()
    %cst_9 = arith.constant dense<0xFF800000> : vector<4x8xf32>
    %7 = vector.multi_reduction <maximumf>, %6, %cst_9 [2] : vector<4x8x8xf32> to vector<4x8xf32>
    %8 = vector.shape_cast %7 : vector<4x8xf32> to vector<4x8x1xf32>
    %9 = vector.broadcast %8 : vector<4x8x1xf32> to vector<4x8x8xf32>
    %10 = arith.subf %6, %9 : vector<4x8x8xf32>
    %11 = math.exp %10 : vector<4x8x8xf32>
    %cst_10 = arith.constant dense<0.000000e+00> : vector<4x8xf32>
    %12 = vector.multi_reduction <add>, %11, %cst_10 [2] : vector<4x8x8xf32> to vector<4x8xf32>
    %13 = vector.shape_cast %12 : vector<4x8xf32> to vector<4x8x1xf32>
    %14 = tpu.reciprocal %13 {approx = true} : vector<4x8x1xf32> -> vector<4x8x1xf32>
    %15 = vector.broadcast %14 : vector<4x8x1xf32> to vector<4x8x8xf32>
    %16 = arith.mulf %11, %15 : vector<4x8x8xf32>
    %17 = arith.truncf %16 : vector<4x8x8xf32> to vector<4x8x8xbf16>
    "tpu.trace_start"() <{level = 10 : i32, message = "hqk,hkd->hqd"}> : () -> ()
    %cst_11 = arith.constant dense<0.000000e+00> : vector<4x8x8xf32>
    %18 = tpu.matmul %17, %5, %cst_11 {dimension_numbers = #tpu.dot_dimension_numbers<[2], [1], [1], [2], [0, 0, 0, 1, 1, 2], [0], [0]>} : vector<4x8x8xbf16>, vector<4x8x8xbf16>, vector<4x8x8xf32> -> vector<4x8x8xf32>
    "tpu.trace_stop"() : () -> ()
    %19 = vector.extract_strided_slice %18 {offsets = [0, 0, 0], sizes = [1, 8, 8], strides = [1, 1, 1]} : vector<4x8x8xf32> to vector<1x8x8xf32>
    %20 = vector.shape_cast %19 : vector<1x8x8xf32> to vector<8x8xf32>
    %21 = arith.truncf %20 : vector<8x8xf32> to vector<8x8xbf16>
    %c0_12 = arith.constant 0 : index
    %c0_13 = arith.constant 0 : index
    %22 = vector.load %arg18[%c0_12, %c0_13] : memref<8x32xbf16, #tpu.memory_space<vmem>>, vector<8x8xbf16>
    tpu.vector_store %arg18[%c0_12, %c0_13], %21 {strides = array<i32>} : memref<8x32xbf16, #tpu.memory_space<vmem>>, vector<8x8xbf16>,
    %23 = vector.extract_strided_slice %18 {offsets = [1, 0, 0], sizes = [1, 8, 8], strides = [1, 1, 1]} : vector<4x8x8xf32> to vector<1x8x8xf32>
    %24 = vector.shape_cast %23 : vector<1x8x8xf32> to vector<8x8xf32>
    %25 = arith.truncf %24 : vector<8x8xf32> to vector<8x8xbf16>
    %c0_14 = arith.constant 0 : index
    %c8 = arith.constant 8 : index
    %26 = vector.load %arg18[%c0_14, %c8] : memref<8x32xbf16, #tpu.memory_space<vmem>>, vector<8x8xbf16>
    tpu.vector_store %arg18[%c0_14, %c8], %25 {strides = array<i32>} : memref<8x32xbf16, #tpu.memory_space<vmem>>, vector<8x8xbf16>,
    %27 = vector.extract_strided_slice %18 {offsets = [2, 0, 0], sizes = [1, 8, 8], strides = [1, 1, 1]} : vector<4x8x8xf32> to vector<1x8x8xf32>
    %28 = vector.shape_cast %27 : vector<1x8x8xf32> to vector<8x8xf32>
    %29 = arith.truncf %28 : vector<8x8xf32> to vector<8x8xbf16>
    %c0_15 = arith.constant 0 : index
    %c16 = arith.constant 16 : index
    %30 = vector.load %arg18[%c0_15, %c16] : memref<8x32xbf16, #tpu.memory_space<vmem>>, vector<8x8xbf16>
    tpu.vector_store %arg18[%c0_15, %c16], %29 {strides = array<i32>} : memref<8x32xbf16, #tpu.memory_space<vmem>>, vector<8x8xbf16>,
    %31 = vector.extract_strided_slice %18 {offsets = [3, 0, 0], sizes = [1, 8, 8], strides = [1, 1, 1]} : vector<4x8x8xf32> to vector<1x8x8xf32>
    %32 = vector.shape_cast %31 : vector<1x8x8xf32> to vector<8x8xf32>
    %33 = arith.truncf %32 : vector<8x8xf32> to vector<8x8xbf16>
    %c0_16 = arith.constant 0 : index
    %c24 = arith.constant 24 : index
    %34 = vector.load %arg18[%c0_16, %c24] : memref<8x32xbf16, #tpu.memory_space<vmem>>, vector<8x8xbf16>
    tpu.vector_store %arg18[%c0_16, %c24], %33 {strides = array<i32>} : memref<8x32xbf16, #tpu.memory_space<vmem>>, vector<8x8xbf16>,
    %c0_17 = arith.constant 0 : index
    %c0_18 = arith.constant 0 : index
    %35 = vector.load %arg18[%c0_17, %c0_18] : memref<8x32xbf16, #tpu.memory_space<vmem>>, vector<8x32xbf16>
    %c0_19 = arith.constant 0 : index
    %c0_20 = arith.constant 0 : index
    %36 = vector.load %arg9[%c0_19, %c0_20] : memref<32x32xbf16, #tpu.memory_space<vmem>>, vector<32x32xbf16>
    %cst_21 = arith.constant dense<0.000000e+00> : vector<8x32xf32>
    %37 = tpu.matmul %35, %36, %cst_21 {dimension_numbers = #tpu.dot_dimension_numbers<[1], [0], [0], [1], [0, 0, 1, 1], [], []>} : vector<8x32xbf16>, vector<32x32xbf16>, vector<8x32xf32> -> vector<8x32xf32>
    %c0_22 = arith.constant 0 : index
    %c0_23 = arith.constant 0 : index
    %c0_24 = arith.constant 0 : index
    %38 = vector.load %arg3[%c0_22, %c0_23, %c0_24] : memref<1x8x32xf32, #tpu.memory_space<vmem>>, vector<1x8x32xf32>
    %39 = vector.shape_cast %38 : vector<1x8x32xf32> to vector<8x32xf32>
    %40 = arith.addf %39, %37 : vector<8x32xf32>
    %c0_25 = arith.constant 0 : index
    %c0_26 = arith.constant 0 : index
    %41 = vector.load %arg6[%c0_25, %c0_26] : memref<1x32xf32, #tpu.memory_space<vmem>>, vector<1x32xf32>
    %c0_27 = arith.constant 0 : index
    %c0_28 = arith.constant 0 : index
    %42 = vector.load %arg7[%c0_27, %c0_28] : memref<1x32xf32, #tpu.memory_space<vmem>>, vector<1x32xf32>
    %cst_29 = arith.constant dense<0.000000e+00> : vector<8xf32>
    %43 = vector.multi_reduction <add>, %40, %cst_29 [1] : vector<8x32xf32> to vector<8xf32>
    %44 = vector.shape_cast %43 : vector<8xf32> to vector<8x1xf32>
    %cst_30 = arith.constant 3.200000e+01 : f32
    %45 = vector.broadcast %cst_30 : f32 to vector<8x1xf32>
    %46 = arith.divf %44, %45 : vector<8x1xf32>
    %47 = vector.broadcast %46 : vector<8x1xf32> to vector<8x32xf32>
    %48 = arith.subf %40, %47 : vector<8x32xf32>
    %49 = arith.mulf %48, %48 : vector<8x32xf32>
    %cst_31 = arith.constant dense<0.000000e+00> : vector<8xf32>
    %50 = vector.multi_reduction <add>, %49, %cst_31 [1] : vector<8x32xf32> to vector<8xf32>
    %51 = vector.shape_cast %50 : vector<8xf32> to vector<8x1xf32>
    %cst_32 = arith.constant 3.200000e+01 : f32
    %52 = vector.broadcast %cst_32 : f32 to vector<8x1xf32>
    %53 = arith.divf %51, %52 : vector<8x1xf32>
    %54 = vector.broadcast %46 : vector<8x1xf32> to vector<8x32xf32>
    %55 = arith.subf %40, %54 : vector<8x32xf32>
    %cst_33 = arith.constant 9.99999974E-6 : f32
    %56 = vector.broadcast %cst_33 : f32 to vector<8x1xf32>
    %57 = arith.addf %53, %56 : vector<8x1xf32>
    %58 = math.rsqrt %57 : vector<8x1xf32>
    %59 = vector.broadcast %58 : vector<8x1xf32> to vector<8x32xf32>
    %60 = arith.mulf %55, %59 : vector<8x32xf32>
    %61 = vector.broadcast %41 : vector<1x32xf32> to vector<8x32xf32>
    %62 = arith.mulf %60, %61 : vector<8x32xf32>
    %63 = vector.broadcast %42 : vector<1x32xf32> to vector<8x32xf32>
    %64 = arith.addf %62, %63 : vector<8x32xf32>
    %65 = arith.truncf %64 : vector<8x32xf32> to vector<8x32xbf16>
    %c0_34 = arith.constant 0 : index
    %c0_35 = arith.constant 0 : index
    %66 = vector.load %arg10[%c0_34, %c0_35] : memref<32x64xbf16, #tpu.memory_space<vmem>>, vector<32x64xbf16>
    %cst_36 = arith.constant dense<0.000000e+00> : vector<8x64xf32>
    %67 = tpu.matmul %65, %66, %cst_36 {dimension_numbers = #tpu.dot_dimension_numbers<[1], [0], [0], [1], [0, 0, 1, 1], [], []>} : vector<8x32xbf16>, vector<32x64xbf16>, vector<8x64xf32> -> vector<8x64xf32>
    %c0_37 = arith.constant 0 : index
    %c0_38 = arith.constant 0 : index
    %68 = vector.load %arg11[%c0_37, %c0_38] : memref<1x64xf32, #tpu.memory_space<vmem>>, vector<1x64xf32>
    %69 = vector.broadcast %68 : vector<1x64xf32> to vector<8x64xf32>
    %70 = arith.addf %67, %69 : vector<8x64xf32>
    %cst_39 = arith.constant 5.000000e-01 : f32
    %71 = vector.broadcast %cst_39 : f32 to vector<8x64xf32>
    %72 = arith.mulf %71, %70 : vector<8x64xf32>
    %cst_40 = arith.constant 0.707106769 : f32
    %73 = vector.broadcast %cst_40 : f32 to vector<8x64xf32>
    %74 = arith.mulf %70, %73 : vector<8x64xf32>
    %75 = math.erf %74 : vector<8x64xf32>
    %cst_41 = arith.constant 1.000000e+00 : f32
    %76 = vector.broadcast %cst_41 : f32 to vector<8x64xf32>
    %77 = arith.addf %76, %75 : vector<8x64xf32>
    %78 = arith.mulf %72, %77 : vector<8x64xf32>
    %79 = arith.truncf %78 : vector<8x64xf32> to vector<8x64xbf16>
    %c0_42 = arith.constant 0 : index
    %c0_43 = arith.constant 0 : index
    %80 = vector.load %arg12[%c0_42, %c0_43] : memref<64x32xbf16, #tpu.memory_space<vmem>>, vector<64x32xbf16>
    %cst_44 = arith.constant dense<0.000000e+00> : vector<8x32xf32>
    %81 = tpu.matmul %79, %80, %cst_44 {dimension_numbers = #tpu.dot_dimension_numbers<[1], [0], [0], [1], [0, 0, 1, 1], [], []>} : vector<8x64xbf16>, vector<64x32xbf16>, vector<8x32xf32> -> vector<8x32xf32>
    %c0_45 = arith.constant 0 : index
    %c0_46 = arith.constant 0 : index
    %82 = vector.load %arg13[%c0_45, %c0_46] : memref<1x32xf32, #tpu.memory_space<vmem>>, vector<1x32xf32>
    %83 = vector.broadcast %82 : vector<1x32xf32> to vector<8x32xf32>
    %84 = arith.addf %81, %83 : vector<8x32xf32>
    %85 = arith.addf %40, %84 : vector<8x32xf32>
    %c0_47 = arith.constant 0 : index
    %c0_48 = arith.constant 0 : index
    %c0_49 = arith.constant 0 : index
    %86 = vector.load %arg14[%c0_47, %c0_48, %c0_49] : memref<1x8x32xf32, #tpu.memory_space<vmem>>, vector<1x8x32xf32>
    %87 = vector.shape_cast %86 : vector<1x8x32xf32> to vector<8x32xf32>
    %88 = vector.shape_cast %85 : vector<8x32xf32> to vector<1x8x32xf32>
    tpu.vector_store %arg14[%c0_47, %c0_48, %c0_49], %88 {strides = array<i32>} : memref<1x8x32xf32, #tpu.memory_space<vmem>>, vector<1x8x32xf32>,
    return
  }
  func.func @transform_0(%arg0: i32, %arg1: i32) -> (i32, i32, i32) {
    %c0_i32 = arith.constant 0 : i32
    %c0_i32_0 = arith.constant 0 : i32
    %c0_i32_1 = arith.constant 0 : i32
    return %arg0, %c0_i32, %c0_i32_0 : i32, i32, i32
  }
  func.func @transform_1(%arg0: i32, %arg1: i32) -> (i32, i32, i32) {
    %c0_i32 = arith.constant 0 : i32
    %c0_i32_0 = arith.constant 0 : i32
    return %arg0, %arg1, %c0_i32 : i32, i32, i32
  }
  func.func @transform_2(%arg0: i32, %arg1: i32) -> (i32, i32) {
    %c0_i32 = arith.constant 0 : i32
    %c0_i32_0 = arith.constant 0 : i32
    %c0_i32_1 = arith.constant 0 : i32
    return %c0_i32, %c0_i32_0 : i32, i32
  }
  func.func @transform_3(%arg0: i32, %arg1: i32) -> (i32, i32) {
    %c0_i32 = arith.constant 0 : i32
    %c0_i32_0 = arith.constant 0 : i32
    %c0_i32_1 = arith.constant 0 : i32
    return %c0_i32, %c0_i32_0 : i32, i32
  }
  func.func @transform_4(%arg0: i32, %arg1: i32) -> (i32, i32) {
    %c0_i32 = arith.constant 0 : i32
    %c0_i32_0 = arith.constant 0 : i32
    %c0_i32_1 = arith.constant 0 : i32
    return %c0_i32, %c0_i32_0 : i32, i32
  }
  func.func @transform_5(%arg0: i32, %arg1: i32) -> (i32, i32) {
    %c0_i32 = arith.constant 0 : i32
    %c0_i32_0 = arith.constant 0 : i32
    %c0_i32_1 = arith.constant 0 : i32
    return %c0_i32, %c0_i32_0 : i32, i32
  }
  func.func @transform_6(%arg0: i32, %arg1: i32) -> (i32, i32) {
    %c0_i32 = arith.constant 0 : i32
    %c0_i32_0 = arith.constant 0 : i32
    %c0_i32_1 = arith.constant 0 : i32
    return %c0_i32, %c0_i32_0 : i32, i32
  }
  func.func @transform_7(%arg0: i32, %arg1: i32) -> (i32, i32) {
    %c0_i32 = arith.constant 0 : i32
    %c0_i32_0 = arith.constant 0 : i32
    %c0_i32_1 = arith.constant 0 : i32
    return %c0_i32, %c0_i32_0 : i32, i32
  }
  func.func @transform_8(%arg0: i32, %arg1: i32) -> (i32, i32) {
    %c0_i32 = arith.constant 0 : i32
    %c0_i32_0 = arith.constant 0 : i32
    %c0_i32_1 = arith.constant 0 : i32
    return %c0_i32, %c0_i32_0 : i32, i32
  }
  func.func @transform_9(%arg0: i32, %arg1: i32) -> (i32, i32) {
    %c0_i32 = arith.constant 0 : i32
    %c0_i32_0 = arith.constant 0 : i32
    %c0_i32_1 = arith.constant 0 : i32
    return %c0_i32, %c0_i32_0 : i32, i32
  }
  func.func @transform_10(%arg0: i32, %arg1: i32) -> (i32, i32) {
    %c0_i32 = arith.constant 0 : i32
    %c0_i32_0 = arith.constant 0 : i32
    %c0_i32_1 = arith.constant 0 : i32
    return %c0_i32, %c0_i32_0 : i32, i32
  }
  func.func @transform_11(%arg0: i32, %arg1: i32) -> (i32, i32) {
    %c0_i32 = arith.constant 0 : i32
    %c0_i32_0 = arith.constant 0 : i32
    %c0_i32_1 = arith.constant 0 : i32
    return %c0_i32, %c0_i32_0 : i32, i32
  }
  func.func @transform_12(%arg0: i32, %arg1: i32) -> (i32, i32, i32) {
    %c0_i32 = arith.constant 0 : i32
    %c0_i32_0 = arith.constant 0 : i32
    return %arg0, %arg1, %c0_i32 : i32, i32, i32
  }
}

</mosaic_0001>

<bundles_post_ra>
// kernel: transformer_forward.2
= control target key start
LH: loop header
LB: loop body
LE: loop exit
PB: predicated region body
PF: predicated region fallthrough
CT: control target
= control target key end

     0   :  { %s1378_s21 = smov 0   ;;  %s1380_s22 = smov 0   ;;  %s1533_s0 = inlined_call_operand.vmem [shape: f32[2,8,32], index: 0, kind: input, shape index: {}, may-alias: {0,1}]   ;;  %s1534_s1 = inlined_call_operand.vmem [shape: f32[2,8,32], index: 1, kind: input, shape index: {}, may-alias: {0,1}]   ;;  %s1535_s2 = inlined_call_operand.vmem [shape: f32[1,32], index: 2, kind: input, shape index: {}]   ;;  %s1536_s3 = inlined_call_operand.vmem [shape: f32[1,32], index: 3, kind: input, shape index: {}]   ;;  %s1537_s4 = inlined_call_operand.vmem [shape: f32[1,32], index: 4, kind: input, shape index: {}]   ;;  %s1538_s5 = inlined_call_operand.vmem [shape: f32[1,32], index: 5, kind: input, shape index: {}]   ;;  %s1539_s6 = inlined_call_operand.vmem [shape: bf16[32,96], index: 6, kind: input, shape index: {}]   ;;  %s1540_s7 = inlined_call_operand.vmem [shape: bf16[32,32], index: 7, kind: input, shape index: {}]   ;;  %s1541_s8 = inlined_call_operand.vmem [shape: bf16[32,64], index: 8, kind: input, shape index: {}]   ;;  %s1542_s9 = inlined_call_operand.vmem [shape: f32[1,64], index: 9, kind: input, shape index: {}]   ;;  %s1543_s10 = inlined_call_operand.vmem [shape: bf16[64,32], index: 10, kind: input, shape index: {}]   ;;  %s1544_s11 = inlined_call_operand.vmem [shape: f32[1,32], index: 11, kind: input, shape index: {}]   ;;  %s1545_s12 = inlined_call_operand.vmem [shape: f32[2,8,32], index: 12, kind: output, shape index: {}]  }
   0x1   :  { %s1382_s23 = smov 0  }
   0x2 LB: > { %s34_s24 = sadd.s32 1, %s1292_s22  ;;  %p1136_p0 = scmp.ge.s32.totalorder %s1296_s23, 1  ;;  %s1296_s23 = sphi %s1382_s23, %s22_s23   ;;  %s1292_s22 = sphi %s1380_s22, %s1547_s22   ;;  %s1288_s21 = sphi %s1378_s21, %s1546_s21  }
   0x3   : > { %p36_p1 = scmp.ge.s32.totalorder %s34_s24, 2  ;;  %p389_p2 = scmp.lt.s32.totalorder %s1296_s23, 3 }
   0x5   : > { %s1549_s24 = smov (%p36_p1, %s34_s24), 0  ;;  %p390_p3 = pnand %p1136_p0, %p389_p2 }
   0x6   : > { %p439_p4 = scmp.lt.s32.totalorder (!%p390_p3), %s1288_s21, 1  ;;  %s1299_s19 = smov (!%p390_p3), 72  }
   0x7   : > { %393 = sbr.rel (%p390_p3) target bundleno = 1908 (0x774), region = 68  ;;  %s1300_s20 = smov (!%p390_p3), 88  }
   0x8   : > { %s1302_s26 = smov (!%p390_p3), 80   ;;  %s1303_s27 = smov (!%p390_p3), 112  }
   0x9   : > { %s1305_s29 = smov (!%p390_p3), 96   ;;  %s1306_s30 = smov (!%p390_p3), 48  }
   0xa   : > { %s1307_s13 = smov (!%p390_p3), 56   ;;  %s1308_s14 = smov (!%p390_p3), 64  }
   0xb   : > { %s1309_s15 = smov (!%p390_p3), 40   ;;  %s1310_s16 = smov (!%p390_p3), 8  }
   0xc   : > { %s1551_s21 = smov (!%p439_p4, %s1288_s21), 1  ;;  %vm465_vm0 = vcmask 261120   ;;  %v1298_v2 = vmov 32.0   ;;  %v1196_v14 = vld [vmem:[%s1539_s6 + $0x8] sm:$0xff]  ;;  %v1195_v15 = vld [vmem:[%s1539_s6] sm:$0xff]  ;;  %vm538_vm5 = vcmask 60416  }
   0xd   : > { %s1396_s25 = sshll.u32 %s1551_s21, 3  ;;  %1250 = vrcp.f32 %v1298_v2  ;;  %529 = vmatpush.bf16.msra.mxu0 %v1196_v14  ;;  %v1244_v25 = vld [vmem:[%s1535_s2] ss:$0 sm:$0xff]  ;;  %s1301_s21 = smov 120   ;;  %vm608_vm6 = vcmask 64512   ;;  %vm736_vm7 = vcmask 1043456  }
   0xe   : > { %s442_s28 = scalar_lea.vmem %s1533_s0, %s1396_s25  ;;  %v1245_v28 = vld [vmem:[%s1536_s3] ss:$0 sm:$0xff]  ;;  %s1311_s17 = smov 16   ;;  %vm818_vm8 = vcmask 126016   ;;  %vm825_vm9 = vcmask 191616   ;;  %vm832_vm10 = vcmask 257216  }
   0xf   : > { %v462_v0 = vld [vmem:[%s442_s28] sm:$0xff]  ;;  %s1304_s28 = smov 104   ;;  %s1312_s18 = smov 24  }
  0x10   : > { %v466_v1 = vsel %vm465_vm0, %v462_v0, 0.0 }
  0x11   : > { %467 = vadd.xlane.f32.xlu0 %v466_v1  ;;  %530 = vmatpush.bf16.msra.mxu0 %v1195_v15 }
  0x13   : > { %v1251_v3 = vpop.eup %1250 }
  0x14   : > { %v470_v4 = vmul.f32 32.0, %v1251_v3  ;;  %vm474_vm1 = vweird.f32 %v1251_v3 }
  0x16   : > { %v471_v5 = vsub.f32 1.0, %v470_v4 }
  0x18   : > { %v472_v6 = vmul.f32 %v1251_v3, %v471_v5 }
  0x1a   : > { %v473_v7 = vadd.f32 %v1251_v3, %v472_v6 }
  0x1c   : > { %v1403_v8 = vsel %vm474_vm1, %v1251_v3, %v473_v7 }
  0x84   : > { %v468_v9 = vpop.xlane.xlu0 %467 }
  0x85   : > { %v476_v10 = vmul.f32 %v1403_v8, %v468_v9 }
  0x87   : > { %v477_v11 = vsub.f32 %v462_v0, %v476_v10 }
  0x89   : > { %v478_v12 = vmul.f32 %v477_v11, %v477_v11 }
  0x8b   : > { %v479_v13 = vsel %vm465_vm0, %v478_v12, 0.0 }
  0x8c   : > { %480 = vadd.xlane.f32.xlu0 %v479_v13 }
  0xff   : > { %v481_v16 = vpop.xlane.xlu0 %480 }
 0x100   : > { %v482_v17 = vmul.f32 %v481_v16, %v1403_v8 }
 0x102   : > { %v483_v18 = vadd.f32 1e-05, %v482_v17 }
 0x104   : > { %1252 = vrsqrt.f32 %v483_v18  ;;  %vm490_vm3 = vweird.f32 %v483_v18 }
 0x10a   : > { %v1253_v19 = vpop.eup %1252 }
 0x10b   : > { %v485_v20 = vmul.f32 %v1253_v19, %v483_v18  ;;  %vm491_vm2 = vweird.f32 %v1253_v19 }
 0x10c   : > { %vm492_vm4 = vmor %vm490_vm3, %vm491_vm2  ;;  %vm1027_vm3 = vcmask 523264  }
 0x10d   : > { %v486_v21 = vmul.f32 %v1253_v19, %v485_v20 }
 0x10f   : > { %v487_v22 = vmul.f32 0.5, %v486_v21 }
 0x111   : > { %v488_v23 = vsub.f32 1.5, %v487_v22 }
 0x113   : > { %v489_v24 = vmul.f32 %v1253_v19, %v488_v23 }
 0x115   : > { %v493_v26 = vsel %vm492_vm4, %v1253_v19, %v489_v24 }
 0x116   : > { %v494_v27 = vmul.f32 %v493_v26, %v477_v11 }
 0x118   : > { %v498_v29 = vmul.f32 %v1244_v25, %v494_v27 }
 0x11a   : > { %v502_v30 = vadd.f32 %v1245_v28, %v498_v29 }
 0x11c   : > { %v503_v31 = vpack.c.bf16 %v502_v30, %v502_v30 }
 0x11e   : > { %1148 = vmatmul.msk.bf16.vlgmr.msra.gmra.mxu0 %vm465_vm0, %v503_v31 }
 0x19b   : > { %v532_v32 = vpop.f32.mrf.mxu0 }
 0x19c   : > { %v536_v33 = vmul.f32 0.35355338, %v532_v32  ;;  %v1421_v34 = vpack.c.bf16 %v532_v32, %v532_v32 }
 0x19e   : > { %v537_v35 = vpack.c.bf16 %v536_v33, %v536_v33  ;;  %586 = vrot.lane.b32.xlu0 %v1421_v34, %s1299_s19  ;;  %556 = vrot.lane.b32.xlu1 %v1421_v34, %s1300_s20  ;;  %s456_s20 = scalar_lea.vmem %s1545_s12, %s1396_s25 }
 0x1a0   : > { %539 = vst.msk [vmem:[#allocation2] sm:$0xf] %vm538_vm5, %v537_v35  ;;  %551 = vrot.lane.b32.xlu2 %v537_v35, %s1301_s21 }
 0x1a3   : > { %v534_v36 = vpop.f32.mrf.mxu0 }
 0x1a6   : > { %571 = vrot.lane.b32.xlu1 %v1421_v34, %s1302_s26 }
 0x1a7   : > { %v596_v49 = vld [vmem:[#allocation2] sm:$0xf] }
 0x1a8   : > { %566 = vrot.lane.b32.xlu2 %v537_v35, %s1303_s27 }
 0x1ae   : > { %581 = vrot.lane.b32.xlu1 %v537_v35, %s1304_s28 }
 0x1b0   : > { %542 = vrot.lane.b32.xlu2 %v1421_v34, %s1305_s29  ;;  %s449_s29 = scalar_lea.vmem %s1534_s1, %s1396_s25 }
 0x1fa   : > { %v552_v37 = vpop.permute.xlu2 %551 }
 0x1fb   : > { %555 = vst.msk [vmem:[#allocation2 + $0x4] sm:$0xf] %vm538_vm5, %v552_v37 }
 0x202   : > { %v567_v38 = vpop.permute.xlu2 %566  ;;  %v597_v52 = vld [vmem:[#allocation2 + $0x4] sm:$0xf] }
 0x203   : > { %570 = vst.msk [vmem:[#allocation2 + $0x8] sm:$0xf] %vm538_vm5, %v567_v38 }
 0x20a   : > { %v543_v39 = vpop.permute.xlu2 %542  ;;  %v598_v54 = vld [vmem:[#allocation2 + $0x8] sm:$0xf] }
 0x20b   : > { %545 = vst.msk [vmem:[#allocation3] sm:$0xf] %vm538_vm5, %v543_v39 }
 0x210   : > { %v587_v40 = vpop.permute.xlu0 %586  ;;  %v557_v41 = vpop.permute.xlu1 %556 }
 0x211   : > { %590 = vst.msk [vmem:[#allocation3 + $0xc] sm:$0xf] %vm538_vm5, %v587_v40 }
 0x212   : > { %560 = vst.msk [vmem:[#allocation3 + $0x4] sm:$0xf] %vm538_vm5, %v557_v41  ;;  %v600_v42 = vld [vmem:[#allocation3] sm:$0xf] }
 0x213   : > { %v613_v43 = vsel %vm608_vm6, %v600_v42, 0 }
 0x214   : > { %622 = vmatpush.bf16.xpose.msra.mxu1 %v613_v43 }
 0x218   : > { %v572_v44 = vpop.permute.xlu1 %571  ;;  %v603_v45 = vld [vmem:[#allocation3 + $0xc] sm:$0xf] }
 0x219   : > { %575 = vst.msk [vmem:[#allocation3 + $0x8] sm:$0xf] %vm538_vm5, %v572_v44  ;;  %v601_v46 = vld [vmem:[#allocation3 + $0x4] sm:$0xf]  ;;  %v670_v47 = vsel %vm608_vm6, %v603_v45, 0 }
 0x21a   : > { %v632_v48 = vsel %vm608_vm6, %v601_v46, 0  ;;  %679 = vmatpush.bf16.xpose.msrb.mxu0 %v670_v47 }
 0x21b   : > { %641 = vmatpush.bf16.xpose.msra.mxu2 %v632_v48  ;;  %1149 = vmatmul.msk.bf16.vlgmr.msra.gmra.mxu1 %vm608_vm6, %v596_v49 }
 0x220   : > { %v582_v50 = vpop.permute.xlu1 %581  ;;  %v602_v51 = vld [vmem:[#allocation3 + $0x8] sm:$0xf] }
 0x221   : > { %585 = vst.msk [vmem:[#allocation2 + $0xc] sm:$0xf] %vm538_vm5, %v582_v50  ;;  %v651_v53 = vsel %vm608_vm6, %v602_v51, 0 }
 0x222   : > { %1150 = vmatmul.msk.bf16.vlgmr.msra.gmra.mxu2 %vm608_vm6, %v597_v52  ;;  %660 = vmatpush.bf16.xpose.msra.mxu3 %v651_v53 }
 0x228   : > { %v599_v55 = vld [vmem:[#allocation2 + $0xc] sm:$0xf] }
 0x229   : > { %1151 = vmatmul.msk.bf16.vlgmr.msra.gmra.mxu3 %vm608_vm6, %v598_v54  ;;  %1152 = vmatmul.msk.bf16.vlgmr.msrb.gmra.mxu0 %vm608_vm6, %v599_v55 }
 0x298   : > { %v624_v56 = vpop.f32.mrf.mxu1 }
 0x299   : > { %v685_v3 = vsel %vm608_vm6, %v624_v56, -inf }
 0x2a0   : > { %v626_v57 = vpop.f32.mrf.mxu1 }
 0x2a5   : > { %v643_v58 = vpop.f32.mrf.mxu2 }
 0x2a6   : > { %v688_v59 = vsel %vm608_vm6, %v643_v58, -inf  ;;  %v681_v60 = vpop.f32.mrf.mxu0 }
 0x2a7   : > { %689 = vmax.xlane.f32.xlu1 %v688_v59  ;;  %v694_v61 = vsel %vm608_vm6, %v681_v60, -inf }
 0x2a8   : > { %695 = vmax.xlane.f32.xlu0 %v694_v61 }
 0x2ac   : > { %v662_v62 = vpop.f32.mrf.mxu3 }
 0x2ad   : > { %v645_v63 = vpop.f32.mrf.mxu2  ;;  %v691_v0 = vsel %vm608_vm6, %v662_v62, -inf }
 0x2ae   : > { %692 = vmax.xlane.f32.xlu2 %v691_v0  ;;  %v683_v1 = vpop.f32.mrf.mxu0 }
 0x2af   : > { %v1198_v1 = vld [vmem:[%s1540_s7 + $0x8] sm:$0xff] }
 0x2b4   : > { %v664_v2 = vpop.f32.mrf.mxu3 }
 0x2b5   : > { %v1197_v2 = vld [vmem:[%s1540_s7] sm:$0xff] }
 0x2b6   : > { %686 = vmax.xlane.f32.xlu2 %v685_v3 }
 0x2bc   : > { %576 = vrot.lane.b32.xlu0 %v1421_v34, %s1306_s30 }
 0x2c0   : > { %561 = vrot.lane.b32.xlu1 %v1421_v34, %s1307_s13 }
 0x2c4   : > { %546 = vrot.lane.b32.xlu0 %v1421_v34, %s1308_s14 }
 0x31a   : > { %v690_v4 = vpop.xlane.xlu1 %689 }
 0x31b   : > { %v698_v5 = vsub.f32 %v643_v58, %v690_v4  ;;  %v696_v6 = vpop.xlane.xlu0 %695 }
 0x31c   : > { %v700_v7 = vsub.f32 %v681_v60, %v696_v6 }
 0x31d   : > { %v703_v9 = vmul.f32 1.442695, %v698_v5 }
 0x31e   : > { %v707_v10 = vmul.f32 1.442695, %v700_v7  ;;  %v868_v7 = vld [vmem:[%s449_s29] sm:$0xff] }
 0x31f   : > { %1254 = vpow2.f32 %v703_v9 }
 0x320   : > { %1256 = vpow2.f32 %v707_v10 }
 0x321   : > { %v693_v11 = vpop.xlane.xlu2 %692 }
 0x322   : > { %v699_v12 = vsub.f32 %v662_v62, %v693_v11 }
 0x324   : > { %v705_v13 = vmul.f32 1.442695, %v699_v12 }
 0x325   : > { %v1255_v14 = vpop.eup %1254 }
 0x326   : > { %v1257_v15 = vpop.eup %1256  ;;  %1258 = vpow2.f32 %v705_v13  ;;  %v712_v16 = vsel %vm608_vm6, %v1255_v14, 0.0 }
 0x327   : > { %713 = vadd.xlane.f32.xlu2 %v712_v16  ;;  %v718_v17 = vsel %vm608_vm6, %v1257_v15, 0.0 }
 0x328   : > { %719 = vadd.xlane.f32.xlu1 %v718_v17 }
 0x329   : > { %v687_v18 = vpop.xlane.xlu2 %686 }
 0x32a   : > { %v697_v19 = vsub.f32 %v624_v56, %v687_v18  ;;  %v1200_v18 = vld [vmem:[%s1541_s8 + $0x8] sm:$0xff] }
 0x32c   : > { %v1259_v20 = vpop.eup %1258  ;;  %v701_v21 = vmul.f32 1.442695, %v697_v19  ;;  %v1199_v19 = vld [vmem:[%s1541_s8] sm:$0xff] }
 0x32d   : > { %v715_v22 = vsel %vm608_vm6, %v1259_v20, 0.0 }
 0x32e   : > { %1260 = vpow2.f32 %v701_v21  ;;  %v577_v23 = vpop.permute.xlu0 %576 }
 0x32f   : > { %716 = vadd.xlane.f32.xlu2 %v715_v22  ;;  %580 = vst.msk [vmem:[#allocation4 + $0x8] sm:$0xf] %vm538_vm5, %v577_v23 }
 0x332   : > { %v562_v24 = vpop.permute.xlu1 %561 }
 0x333   : > { %565 = vst.msk [vmem:[#allocation4 + $0x4] sm:$0xf] %vm538_vm5, %v562_v24 }
 0x334   : > { %v1261_v25 = vpop.eup %1260 }
 0x335   : > { %v709_v26 = vsel %vm608_vm6, %v1261_v25, 0.0 }
 0x336   : > { %710 = vadd.xlane.f32.xlu0 %v709_v26  ;;  %v547_v27 = vpop.permute.xlu0 %546  ;;  %v606_v28 = vld [vmem:[#allocation4 + $0x8] sm:$0xf] }
 0x337   : > { %549 = vst.msk [vmem:[#allocation4] sm:$0xf] %vm538_vm5, %v547_v27  ;;  %v776_v29 = vsel %vm736_vm7, %v606_v28, 0 }
 0x338   : > { %785 = vmatpush.bf16.msrb.mxu3 %v776_v29  ;;  %v1246_v29 = vld [vmem:[%s1537_s4] ss:$0 sm:$0xff] }
 0x33a   : > { %v605_v30 = vld [vmem:[#allocation4 + $0x4] sm:$0xf] }
 0x33b   : > { %v757_v31 = vsel %vm736_vm7, %v605_v30, 0 }
 0x33c   : > { %766 = vmatpush.bf16.msrb.mxu2 %v757_v31 }
 0x33e   : > { %v604_v32 = vld [vmem:[#allocation4] sm:$0xf] }
 0x33f   : > { %v738_v33 = vsel %vm736_vm7, %v604_v32, 0 }
 0x340   : > { %747 = vmatpush.bf16.msrb.mxu1 %v738_v33  ;;  %939 = vmatpush.bf16.msra.mxu2 %v1200_v18 }
 0x344   : > { %861 = vmatpush.bf16.msra.mxu1 %v1198_v1  ;;  %940 = vmatpush.bf16.msra.mxu2 %v1199_v19 }
 0x347   : > { %591 = vrot.lane.b32.xlu2 %v1421_v34, %s1309_s15 }
 0x348   : > { %862 = vmatpush.bf16.msra.mxu1 %v1197_v2 }
 0x39a   : > { %v714_v35 = vpop.xlane.xlu2 %713 }
 0x39b   : > { %1262 = vrcp.f32 %v714_v35  ;;  %v720_v40 = vpop.xlane.xlu1 %719 }
 0x3a1   : > { %v1263_v36 = vpop.eup %1262 }
 0x3a2   : > { %v726_v37 = vmul.f32 %v1263_v36, %v1255_v14  ;;  %v717_v38 = vpop.xlane.xlu2 %716  ;;  %v1248_v36 = vld [vmem:[%s1542_s9] ss:$0 sm:$0xff] }
 0x3a3   : > { %1264 = vrcp.f32 %v717_v38 }
 0x3a4   : > { %v730_v39 = vpack.c.bf16 %v726_v37, %v726_v37  ;;  %1266 = vrcp.f32 %v720_v40 }
 0x3a6   : > { %1154 = vmatmul.msk.bf16.vlgmr.msrb.gmra.mxu2 %vm608_vm6, %v730_v39 }
 0x3a9   : > { %v1265_v41 = vpop.eup %1264  ;;  %v711_v42 = vpop.xlane.xlu0 %710 }
 0x3aa   : > { %v727_v43 = vmul.f32 %v1265_v41, %v1259_v20  ;;  %v592_v44 = vpop.permute.xlu2 %591  ;;  %1268 = vrcp.f32 %v711_v42  ;;  %v1267_v34 = vpop.eup %1266 }
 0x3ab   : > { %595 = vst.msk [vmem:[#allocation4 + $0xc] sm:$0xf] %vm538_vm5, %v592_v44  ;;  %v728_v47 = vmul.f32 %v1267_v34, %v1257_v15 }
 0x3ac   : > { %v731_v45 = vpack.c.bf16 %v727_v43, %v727_v43  ;;  %v1204_v43 = vld [vmem:[%s1543_s10 + $0x18] sm:$0xff] }
 0x3ad   : > { %v732_v52 = vpack.c.bf16 %v728_v47, %v728_v47  ;;  %1035 = vmatpush.bf16.msra.mxu3 %v1204_v43  ;;  %v1203_v47 = vld [vmem:[%s1543_s10 + $0x10] sm:$0xff] }
 0x3ae   : > { %1155 = vmatmul.msk.bf16.vlgmr.msrb.gmra.mxu3 %vm608_vm6, %v731_v45 }
 0x3b0   : > { %v1269_v46 = vpop.eup %1268 }
 0x3b1   : > { %v725_v48 = vmul.f32 %v1269_v46, %v1261_v25  ;;  %1036 = vmatpush.bf16.msra.mxu3 %v1203_v47 }
 0x3b2   : > { %v607_v49 = vld [vmem:[#allocation4 + $0xc] sm:$0xf] }
 0x3b3   : > { %v729_v50 = vpack.c.bf16 %v725_v48, %v725_v48  ;;  %v795_v51 = vsel %vm736_vm7, %v607_v49, 0 }
 0x3b4   : > { %804 = vmatpush.bf16.msra.mxu0 %v795_v51 }
 0x3b5   : > { %1153 = vmatmul.msk.bf16.vlgmr.msrb.gmra.mxu1 %vm608_vm6, %v729_v50 }
 0x3b7   : > { %1156 = vmatmul.msk.bf16.vlgmr.msra.gmra.mxu0 %vm608_vm6, %v732_v52  ;;  %v1202_v52 = vld [vmem:[%s1543_s10 + $0x8] sm:$0xff] }
 0x3b8   : > { %1037 = vmatpush.bf16.msra.mxu3 %v1202_v52 }
 0x429   : > { %v768_v53 = vpop.f32.mrf.mxu2 }
 0x42a   : > { %v813_v54 = vpack.c.bf16 %v768_v53, %v768_v53 }
 0x42c   : > { %815 = vrot.lane.b32.xlu2 %v813_v54, %s1310_s16 }
 0x431   : > { %v770_v55 = vpop.f32.mrf.mxu2  ;;  %v787_v56 = vpop.f32.mrf.mxu3 }
 0x432   : > { %v820_v57 = vpack.c.bf16 %v787_v56, %v787_v56  ;;  %v749_v58 = vpop.f32.mrf.mxu1  ;;  %v1201_v56 = vld [vmem:[%s1543_s10] sm:$0xff] }
 0x433   : > { %v810_v59 = vpack.c.bf16 %v749_v58, %v749_v58  ;;  %1038 = vmatpush.bf16.msra.mxu3 %v1201_v56 }
 0x434   : > { %822 = vrot.lane.b32.xlu2 %v820_v57, %s1311_s17  ;;  %v806_v60 = vpop.f32.mrf.mxu0 }
 0x435   : > { %812 = vst.msk [vmem:[#allocation5] sm:$0xf] %vm538_vm5, %v810_v59  ;;  %v827_v62 = vpack.c.bf16 %v806_v60, %v806_v60 }
 0x439   : > { %v789_v61 = vpop.f32.mrf.mxu3 }
 0x43a   : > { %v751_v63 = vpop.f32.mrf.mxu1 }
 0x43c   : > { %829 = vrot.lane.b32.xlu2 %v827_v62, %s1312_s18  ;;  %v808_v0 = vpop.f32.mrf.mxu0 }
 0x486   : > { %v816_v3 = vpop.permute.xlu2 %815 }
 0x487   : > { %819 = vst.msk [vmem:[#allocation5] sm:$0xf] %vm818_vm8, %v816_v3 }
 0x48e   : > { %v823_v4 = vpop.permute.xlu2 %822 }
 0x48f   : > { %826 = vst.msk [vmem:[#allocation5] sm:$0xf] %vm825_vm9, %v823_v4 }
 0x496   : > { %v830_v5 = vpop.permute.xlu2 %829 }
 0x497   : > { %833 = vst.msk [vmem:[#allocation5] sm:$0xf] %vm832_vm10, %v830_v5 }
 0x49e   : > { %v834_v6 = vld [vmem:[#allocation5] sm:$0xf] }
 0x49f   : > { %1165 = vmatmul.msk.bf16.vlgmr.msra.gmra.mxu1 %vm465_vm0, %v834_v6 }
 0x51c   : > { %v864_v9 = vpop.f32.mrf.mxu1 }
 0x51d   : > { %v1479_v10 = vadd.f32 %v868_v7, %v864_v9 }
 0x51f   : > { %v872_v11 = vsel %vm465_vm0, %v1479_v10, 0.0 }
 0x520   : > { %873 = vadd.xlane.f32.xlu1 %v872_v11 }
 0x524   : > { %v866_v12 = vpop.f32.mrf.mxu1 }
 0x593   : > { %v874_v13 = vpop.xlane.xlu1 %873 }
 0x594   : > { %v882_v14 = vmul.f32 %v874_v13, %v1403_v8 }
 0x596   : > { %v883_v15 = vsub.f32 %v1479_v10, %v882_v14 }
 0x598   : > { %v884_v16 = vmul.f32 %v883_v15, %v883_v15 }
 0x59a   : > { %v885_v17 = vsel %vm465_vm0, %v884_v16, 0.0 }
 0x59b   : > { %886 = vadd.xlane.f32.xlu2 %v885_v17 }
 0x60e   : > { %v887_v20 = vpop.xlane.xlu2 %886 }
 0x60f   : > { %v888_v21 = vmul.f32 %v887_v20, %v1403_v8  ;;  %v1247_v8 = vld [vmem:[%s1538_s5] ss:$0 sm:$0xff] }
 0x611   : > { %v889_v22 = vadd.f32 1e-05, %v888_v21  ;;  %v1249_v21 = vld [vmem:[%s1544_s11] ss:$0 sm:$0xff] }
 0x613   : > { %1270 = vrsqrt.f32 %v889_v22  ;;  %vm896_vm12 = vweird.f32 %v889_v22 }
 0x619   : > { %v1271_v23 = vpop.eup %1270 }
 0x61a   : > { %v891_v24 = vmul.f32 %v1271_v23, %v889_v22  ;;  %vm897_vm11 = vweird.f32 %v1271_v23 }
 0x61b   : > { %vm898_vm13 = vmor %vm896_vm12, %vm897_vm11 }
 0x61c   : > { %v892_v25 = vmul.f32 %v1271_v23, %v891_v24 }
 0x61e   : > { %v893_v26 = vmul.f32 0.5, %v892_v25 }
 0x620   : > { %v894_v27 = vsub.f32 1.5, %v893_v26 }
 0x622   : > { %v895_v28 = vmul.f32 %v1271_v23, %v894_v27 }
 0x624   : > { %v899_v30 = vsel %vm898_vm13, %v1271_v23, %v895_v28 }
 0x625   : > { %v900_v31 = vmul.f32 %v899_v30, %v883_v15 }
 0x627   : > { %v904_v32 = vmul.f32 %v1246_v29, %v900_v31 }
 0x629   : > { %v908_v33 = vadd.f32 %v1247_v8, %v904_v32 }
 0x62b   : > { %v909_v35 = vpack.c.bf16 %v908_v33, %v908_v33 }
 0x62d   : > { %1174 = vmatmul.msk.bf16.vlgmr.msra.gmra.mxu2 %vm465_vm0, %v909_v35 }
 0x6b0   : > { %v942_v37 = vpop.f32.mrf.mxu2 }
 0x6b1   : > { %v943_v38 = vadd.f32 %v1248_v36, %v942_v37 }
 0x6b3   : > { %v947_v39 = vmul.f32 0.70710677, %v943_v38  ;;  %v946_v17 = vmul.f32 0.5, %v943_v38 }
 0x6b5   : > { %v948_v40 = vmul.f32 %v947_v39, %v947_v39 }
 0x6b7   : > { %v949_v41 = vmin.f32 %v948_v40, 16.0 }
 0x6b8   : > { %v944_v42 = vpop.f32.mrf.mxu2 }
 0x6b9   : > { %v950_v44 = vmul.f32 2.1237322e-06, %v949_v41  ;;  %v961_v45 = vmul.f32 3.8918573e-05, %v949_v41 }
 0x6bb   : > { %v951_v34 = vadd.f32 0.00028619796, %v950_v44  ;;  %v962_v46 = vadd.f32 0.001143296, %v961_v45 }
 0x6bd   : > { %v952_v48 = vmul.f32 %v951_v34, %v949_v41  ;;  %v963_v49 = vmul.f32 %v962_v46, %v949_v41 }
 0x6bf   : > { %v964_v50 = vadd.f32 0.014752088, %v963_v49  ;;  %v953_v51 = vadd.f32 0.0036580483, %v952_v48 }
 0x6c1   : > { %v965_v53 = vmul.f32 %v964_v50, %v949_v41  ;;  %v954_v55 = vmul.f32 %v953_v51, %v949_v41 }
 0x6c3   : > { %v966_v54 = vadd.f32 0.112945676, %v965_v53  ;;  %v955_v59 = vadd.f32 0.05243302, %v954_v55 }
 0x6c5   : > { %v967_v57 = vmul.f32 %v966_v54, %v949_v41  ;;  %v956_v62 = vmul.f32 %v955_v59, %v949_v41 }
 0x6c7   : > { %v968_v58 = vadd.f32 0.4994258, %v967_v57  ;;  %v957_v63 = vadd.f32 0.18741608, %v956_v62 }
 0x6c9   : > { %v969_v60 = vmul.f32 %v968_v58, %v949_v41  ;;  %v958_v1 = vmul.f32 %v957_v63, %v949_v41 }
 0x6cb   : > { %v970_v61 = vadd.f32 1.0, %v969_v60  ;;  %v959_v5 = vadd.f32 1.1283791, %v958_v1 }
 0x6cd   : > { %1272 = vrcp.f32 %v970_v61  ;;  %v982_v4 = vand.u32 2147483648, %v970_v61  ;;  %v980_v7 = vand.u32 2147483647, %v970_v61  ;;  %vm976_vm15 = vweird.f32 %v970_v61 }
 0x6ce   : > { %v960_v12 = vmul.f32 %v959_v5, %v947_v39 }
 0x6cf   : > { %v983_v11 = vor.u32 1.1754944e-38, %v982_v4  ;;  %vm981_vm2 = vcmp.eq.f32.partialorder %v980_v7, 8.507059e+37 }
 0x6d3   : > { %v1273_v0 = vpop.eup %1272 }
 0x6d4   : > { %v972_v2 = vmul.f32 %v1273_v0, %v970_v61  ;;  %vm977_vm14 = vweird.f32 %v1273_v0 }
 0x6d5   : > { %vm978_vm1 = vmor %vm976_vm15, %vm977_vm14 }
 0x6d6   : > { %v973_v3 = vsub.f32 1.0, %v972_v2 }
 0x6d8   : > { %v974_v6 = vmul.f32 %v1273_v0, %v973_v3 }
 0x6da   : > { %v975_v9 = vadd.f32 %v1273_v0, %v974_v6 }
 0x6dc   : > { %v979_v13 = vsel %vm978_vm1, %v1273_v0, %v975_v9 }
 0x6dd   : > { %v984_v14 = vsel %vm981_vm2, %v983_v11, %v979_v13 }
 0x6de   : > { %v985_v15 = vmul.f32 %v984_v14, %v960_v12 }
 0x6e0   : > { %v1175_v16 = vclamps-f32 %v985_v15, 1.0 }
 0x6e2   : > { %v988_v18 = vadd.f32 1.0, %v1175_v16 }
 0x6e4   : > { %v989_v19 = vmul.f32 %v988_v18, %v946_v17 }
 0x6e6   : > { %v990_v20 = vpack.c.bf16 %v989_v19, %v989_v19 }
 0x6e8   : > { %1192 = vmatmul.msk.bf16.vlgmr.msra.gmra.mxu3 %vm1027_vm3, %v990_v20 }
 0x76b   : > { %v1040_v22 = vpop.f32.mrf.mxu3 }
 0x76c   : > { %v1041_v23 = vadd.f32 %v1249_v21, %v1040_v22 }
 0x76e   : > { %v1044_v24 = vadd.f32 %v1041_v23, %v1479_v10 }
 0x770   : > { %1045 = vst.msk [vmem:[%s456_s20] sm:$0xff] %vm465_vm0, %v1044_v24 }
 0x773   : > { %v1042_v25 = vpop.f32.mrf.mxu3 }
 0x774 PF: > { %s22_s23 = sadd.s32 1, %s1296_s23   ;;  %s1546_s21 = smov %s1292_s22 }
 0x775   : > { %p19_p5 = scmp.ge.s32.totalorder %s22_s23, 4   ;;  %s1547_s22 = smov %s1549_s24 }
 0x777   :  { %21 = sbr.rel (!%p19_p5) target bundleno = 2 (0x2), region = 114 }

// kernel: transformer_forward.3
= control target key start
LH: loop header
LB: loop body
LE: loop exit
PB: predicated region body
PF: predicated region fallthrough
CT: control target
= control target key end

     0   :  { %s1696_s0 = inlined_call_operand.vmem [shape: f32[2,8,32], index: 0, kind: input, shape index: {}, may-alias: {0,1}]   ;;  %s1697_s1 = inlined_call_operand.vmem [shape: f32[2,8,32], index: 1, kind: input, shape index: {}, may-alias: {0,1}]   ;;  %s1698_s2 = inlined_call_operand.vmem [shape: f32[1,32], index: 2, kind: input, shape index: {}]   ;;  %s1699_s3 = inlined_call_operand.vmem [shape: f32[1,32], index: 3, kind: input, shape index: {}]   ;;  %s1700_s4 = inlined_call_operand.vmem [shape: f32[1,32], index: 4, kind: input, shape index: {}]   ;;  %s1701_s5 = inlined_call_operand.vmem [shape: f32[1,32], index: 5, kind: input, shape index: {}]   ;;  %s1702_s6 = inlined_call_operand.vmem [shape: bf16[32,96], index: 6, kind: input, shape index: {}]   ;;  %s1703_s7 = inlined_call_operand.vmem [shape: bf16[32,32], index: 7, kind: input, shape index: {}]   ;;  %s1704_s8 = inlined_call_operand.vmem [shape: bf16[32,64], index: 8, kind: input, shape index: {}]   ;;  %s1705_s9 = inlined_call_operand.vmem [shape: f32[1,64], index: 9, kind: input, shape index: {}]   ;;  %s1706_s10 = inlined_call_operand.vmem [shape: bf16[64,32], index: 10, kind: input, shape index: {}]   ;;  %s1707_s11 = inlined_call_operand.vmem [shape: f32[1,32], index: 11, kind: input, shape index: {}]   ;;  %s1708_s12 = inlined_call_operand.hbm [shape: f32[2,8,32], index: 12, kind: output, shape index: {}]  }
   0x1   :  { %1710 = sst [smem:[#allocation9_spill]] %s1696_s0 }
   0x2   :  { %1711 = sst [smem:[#allocation10_spill]] %s1697_s1 }
   0x3   :  { %1712 = sst [smem:[#allocation11_spill]] %s1698_s2 }
   0x4   :  { %1713 = sst [smem:[#allocation12_spill]] %s1699_s3 }
   0x5   :  { %17 = vsyncpa [#allocation7], 0 }
   0x6   :  { %19 = vsyncpa [#allocation7 + $0x1], 0  ;;  %s1475_s21 = smov 0   ;;  %s1477_s22 = smov 0  }
   0x7   :  { %s1479_s23 = smov 0   ;;  %s1481_s24 = smov 0  }
   0x8   :  { %s1483_s25 = smov 0   ;;  %s1485_s26 = smov 0  }
   0x9 LB: > { %s1140_s27 = sadd.s32 4294967295, %s1393_s26   ;;  %s1141_s28 = sadd.s32 4294967294, %s1393_s26   ;;  %s1393_s26 = sphi %s1485_s26, %s25_s26   ;;  %s1389_s25 = sphi %s1483_s25, %s1725_s25   ;;  %s1385_s24 = sphi %s1481_s24, %s1724_s24   ;;  %s1381_s23 = sphi %s1479_s23, %s1723_s23   ;;  %s1377_s22 = sphi %s1477_s22, %s1722_s22   ;;  %s1373_s21 = sphi %s1475_s21, %s1721_s21  }
   0xa   : > { %s37_s29 = sadd.s32 1, %s1389_s25  ;;  %s310_s30 = sadd.s32 1, %s1381_s23 }
   0xb   : > { %p39_p0 = scmp.ge.s32.totalorder %s37_s29, 2  ;;  %p320_p1 = scmp.ne.s32.totalorder %s1381_s23, %s1377_s22 }
   0xc   : > { %p321_p2 = scmp.eq.s32.totalorder %s1140_s27, 1  ;;  %p326_p3 = scmp.ne.s32.totalorder %s1377_s22, %s1373_s21 }
   0xd   : > { %s1727_s29 = smov (%p39_p0, %s37_s29), 0  ;;  %p327_p5 = scmp.eq.s32.totalorder %s1141_s28, 1 }
   0xe   : > { %p1515_p4 = por %p321_p2, %p320_p1  ;;  %s305_s14 = ssub.s32 %s1389_s25, %s1727_s29 }
   0xf   : > { %p1144_p6 = scmp.ge.s32.totalorder %s1393_s26, 1  ;;  %p308_p7 = scmp.eq.s32.totalorder %s305_s14, 0 }
  0x10   : > { %p1522_p8 = por %p327_p5, %p326_p3  ;;  %p392_p9 = scmp.lt.s32.totalorder %s1393_s26, 3 }
  0x11   : > { %s1528_s16 = scalar_select %p308_p7, %s1381_s23, %s310_s30  }
  0x12   : > { %p393_p10 = pnand %p1144_p6, %p392_p9 }
  0x13   : > { %p440_p11 = scmp.lt.s32.totalorder (!%p393_p10), %s1385_s24, 1  ;;  %s1716_s0 = sld [smem:[#allocation9_spill]] (!%p393_p10) }
  0x14   : > { %396 = sbr.rel (%p393_p10) target bundleno = 1922 (0x782), region = 68  ;;  %s1717_s2 = sld [smem:[#allocation11_spill]] (!%p393_p10) }
  0x15   : > { %s1718_s3 = sld [smem:[#allocation12_spill]] (!%p393_p10)  ;;  %s1396_s14 = smov (!%p393_p10), 72  }
  0x16   : > { %s1397_s19 = smov (!%p393_p10), 88   ;;  %s1398_s20 = smov (!%p393_p10), 120  }
  0x17   : > { %s1400_s28 = smov (!%p393_p10), 112   ;;  %s1401_s30 = smov (!%p393_p10), 104  }
  0x18   : > { %s1720_s1 = sld [smem:[#allocation10_spill]] (!%p393_p10) }
  0x19   : > { %s1532_s17 = scalar_select %p440_p11, %s1385_s24, 1  ;;  %vm459_vm0 = vcmask 261120   ;;  %v1395_v2 = vmov 32.0   ;;  %v1206_v14 = vld [vmem:[%s1702_s6 + $0x8] sm:$0xff]  ;;  %v1205_v15 = vld [vmem:[%s1702_s6] sm:$0xff]  ;;  %vm532_vm5 = vcmask 60416  }
  0x1a   : > { %1291 = vrcp.f32 %v1395_v2  ;;  %523 = vmatpush.bf16.msra.mxu0 %v1206_v14  ;;  %v1285_v25 = vld [vmem:[%s1717_s2] ss:$0 sm:$0xff]  ;;  %vm602_vm6 = vcmask 64512   ;;  %vm730_vm7 = vcmask 1043456   ;;  %vm812_vm8 = vcmask 126016  }
  0x1b   : > { %s1709_s18 = sshll.u32 %s1532_s17, 3  ;;  %v1286_v28 = vld [vmem:[%s1718_s3] ss:$0 sm:$0xff]  ;;  %vm819_vm9 = vcmask 191616   ;;  %vm826_vm10 = vcmask 257216  }
  0x1c   : > { %s443_s27 = scalar_lea.vmem %s1716_s0, %s1709_s18  ;;  %s1402_s18 = smov 96  }
  0x1d   : > { %v456_v0 = vld [vmem:[%s443_s27] sm:$0xff]  ;;  %s1399_s27 = smov 80  }
  0x1e   : > { %v460_v1 = vsel %vm459_vm0, %v456_v0, 0.0  ;;  %524 = vmatpush.bf16.msra.mxu0 %v1205_v15 }
  0x1f   : > { %461 = vadd.xlane.f32.xlu0 %v460_v1 }
  0x20   : > { %v1292_v3 = vpop.eup %1291 }
  0x21   : > { %v464_v4 = vmul.f32 32.0, %v1292_v3  ;;  %vm468_vm1 = vweird.f32 %v1292_v3 }
  0x23   : > { %v465_v5 = vsub.f32 1.0, %v464_v4 }
  0x25   : > { %v466_v6 = vmul.f32 %v1292_v3, %v465_v5 }
  0x27   : > { %v467_v7 = vadd.f32 %v1292_v3, %v466_v6 }
  0x29   : > { %v1541_v8 = vsel %vm468_vm1, %v1292_v3, %v467_v7 }
  0x92   : > { %v462_v9 = vpop.xlane.xlu0 %461 }
  0x93   : > { %v470_v10 = vmul.f32 %v1541_v8, %v462_v9 }
  0x95   : > { %v471_v11 = vsub.f32 %v456_v0, %v470_v10 }
  0x97   : > { %v472_v12 = vmul.f32 %v471_v11, %v471_v11 }
  0x99   : > { %v473_v13 = vsel %vm459_vm0, %v472_v12, 0.0 }
  0x9a   : > { %474 = vadd.xlane.f32.xlu0 %v473_v13 }
 0x10d   : > { %v475_v16 = vpop.xlane.xlu0 %474 }
 0x10e   : > { %v476_v17 = vmul.f32 %v475_v16, %v1541_v8 }
 0x110   : > { %v477_v18 = vadd.f32 1e-05, %v476_v17 }
 0x112   : > { %1293 = vrsqrt.f32 %v477_v18  ;;  %vm484_vm3 = vweird.f32 %v477_v18 }
 0x118   : > { %v1294_v19 = vpop.eup %1293 }
 0x119   : > { %v479_v20 = vmul.f32 %v1294_v19, %v477_v18  ;;  %vm485_vm2 = vweird.f32 %v1294_v19 }
 0x11a   : > { %vm486_vm4 = vmor %vm484_vm3, %vm485_vm2  ;;  %vm1021_vm3 = vcmask 523264  }
 0x11b   : > { %v480_v21 = vmul.f32 %v1294_v19, %v479_v20 }
 0x11d   : > { %v481_v22 = vmul.f32 0.5, %v480_v21 }
 0x11f   : > { %v482_v23 = vsub.f32 1.5, %v481_v22 }
 0x121   : > { %v483_v24 = vmul.f32 %v1294_v19, %v482_v23 }
 0x123   : > { %v487_v26 = vsel %vm486_vm4, %v1294_v19, %v483_v24 }
 0x124   : > { %v488_v27 = vmul.f32 %v487_v26, %v471_v11 }
 0x126   : > { %v492_v29 = vmul.f32 %v1285_v25, %v488_v27 }
 0x128   : > { %v496_v30 = vadd.f32 %v1286_v28, %v492_v29 }
 0x12a   : > { %v497_v31 = vpack.c.bf16 %v496_v30, %v496_v30 }
 0x12c   : > { %1156 = vmatmul.msk.bf16.vlgmr.msra.gmra.mxu0 %vm459_vm0, %v497_v31 }
 0x1a9   : > { %v526_v32 = vpop.f32.mrf.mxu0 }
 0x1aa   : > { %v530_v33 = vmul.f32 0.35355338, %v526_v32  ;;  %v1559_v34 = vpack.c.bf16 %v526_v32, %v526_v32 }
 0x1ac   : > { %v531_v35 = vpack.c.bf16 %v530_v33, %v530_v33  ;;  %580 = vrot.lane.b32.xlu0 %v1559_v34, %s1396_s14  ;;  %550 = vrot.lane.b32.xlu1 %v1559_v34, %s1397_s19  ;;  %s1404_s14 = smov 56   ;;  %s1405_s19 = smov 64  }
 0x1ae   : > { %533 = vst.msk [vmem:[#allocation2] sm:$0xf] %vm532_vm5, %v531_v35  ;;  %545 = vrot.lane.b32.xlu2 %v531_v35, %s1398_s20  ;;  %s1406_s20 = smov 40  }
 0x1b1   : > { %v528_v36 = vpop.f32.mrf.mxu0 }
 0x1b4   : > { %565 = vrot.lane.b32.xlu1 %v1559_v34, %s1399_s27  ;;  %s1407_s27 = smov 8  }
 0x1b5   : > { %v590_v49 = vld [vmem:[#allocation2] sm:$0xf] }
 0x1b6   : > { %560 = vrot.lane.b32.xlu2 %v531_v35, %s1400_s28  ;;  %s1408_s28 = smov 16  }
 0x1bc   : > { %575 = vrot.lane.b32.xlu1 %v531_v35, %s1401_s30  ;;  %s1409_s30 = smov 24  }
 0x1be   : > { %536 = vrot.lane.b32.xlu2 %v1559_v34, %s1402_s18  ;;  %s1403_s18 = smov 48  }
 0x208   : > { %v546_v37 = vpop.permute.xlu2 %545 }
 0x209   : > { %549 = vst.msk [vmem:[#allocation2 + $0x4] sm:$0xf] %vm532_vm5, %v546_v37 }
 0x210   : > { %v561_v38 = vpop.permute.xlu2 %560  ;;  %v591_v52 = vld [vmem:[#allocation2 + $0x4] sm:$0xf] }
 0x211   : > { %564 = vst.msk [vmem:[#allocation2 + $0x8] sm:$0xf] %vm532_vm5, %v561_v38 }
 0x218   : > { %v537_v39 = vpop.permute.xlu2 %536  ;;  %v592_v54 = vld [vmem:[#allocation2 + $0x8] sm:$0xf] }
 0x219   : > { %539 = vst.msk [vmem:[#allocation3] sm:$0xf] %vm532_vm5, %v537_v39 }
 0x21e   : > { %v581_v40 = vpop.permute.xlu0 %580  ;;  %v551_v41 = vpop.permute.xlu1 %550 }
 0x21f   : > { %584 = vst.msk [vmem:[#allocation3 + $0xc] sm:$0xf] %vm532_vm5, %v581_v40 }
 0x220   : > { %554 = vst.msk [vmem:[#allocation3 + $0x4] sm:$0xf] %vm532_vm5, %v551_v41  ;;  %v594_v42 = vld [vmem:[#allocation3] sm:$0xf] }
 0x221   : > { %v607_v43 = vsel %vm602_vm6, %v594_v42, 0 }
 0x222   : > { %616 = vmatpush.bf16.xpose.msra.mxu1 %v607_v43 }
 0x226   : > { %v566_v44 = vpop.permute.xlu1 %565  ;;  %v597_v45 = vld [vmem:[#allocation3 + $0xc] sm:$0xf] }
 0x227   : > { %569 = vst.msk [vmem:[#allocation3 + $0x8] sm:$0xf] %vm532_vm5, %v566_v44  ;;  %v595_v46 = vld [vmem:[#allocation3 + $0x4] sm:$0xf]  ;;  %v664_v47 = vsel %vm602_vm6, %v597_v45, 0 }
 0x228   : > { %v626_v48 = vsel %vm602_vm6, %v595_v46, 0  ;;  %673 = vmatpush.bf16.xpose.msrb.mxu0 %v664_v47 }
 0x229   : > { %635 = vmatpush.bf16.xpose.msra.mxu2 %v626_v48  ;;  %1157 = vmatmul.msk.bf16.vlgmr.msra.gmra.mxu1 %vm602_vm6, %v590_v49 }
 0x22e   : > { %v576_v50 = vpop.permute.xlu1 %575  ;;  %v596_v51 = vld [vmem:[#allocation3 + $0x8] sm:$0xf] }
 0x22f   : > { %579 = vst.msk [vmem:[#allocation2 + $0xc] sm:$0xf] %vm532_vm5, %v576_v50  ;;  %v645_v53 = vsel %vm602_vm6, %v596_v51, 0 }
 0x230   : > { %1158 = vmatmul.msk.bf16.vlgmr.msra.gmra.mxu2 %vm602_vm6, %v591_v52  ;;  %654 = vmatpush.bf16.xpose.msra.mxu3 %v645_v53 }
 0x236   : > { %v593_v55 = vld [vmem:[#allocation2 + $0xc] sm:$0xf] }
 0x237   : > { %1159 = vmatmul.msk.bf16.vlgmr.msra.gmra.mxu3 %vm602_vm6, %v592_v54  ;;  %1160 = vmatmul.msk.bf16.vlgmr.msrb.gmra.mxu0 %vm602_vm6, %v593_v55 }
 0x2a6   : > { %v618_v56 = vpop.f32.mrf.mxu1 }
 0x2a7   : > { %v679_v3 = vsel %vm602_vm6, %v618_v56, -inf }
 0x2ae   : > { %v620_v57 = vpop.f32.mrf.mxu1 }
 0x2b3   : > { %v637_v58 = vpop.f32.mrf.mxu2 }
 0x2b4   : > { %v682_v59 = vsel %vm602_vm6, %v637_v58, -inf  ;;  %v675_v60 = vpop.f32.mrf.mxu0 }
 0x2b5   : > { %683 = vmax.xlane.f32.xlu1 %v682_v59  ;;  %v688_v61 = vsel %vm602_vm6, %v675_v60, -inf }
 0x2b6   : > { %689 = vmax.xlane.f32.xlu0 %v688_v61 }
 0x2ba   : > { %v656_v62 = vpop.f32.mrf.mxu3 }
 0x2bb   : > { %v639_v63 = vpop.f32.mrf.mxu2  ;;  %v685_v0 = vsel %vm602_vm6, %v656_v62, -inf }
 0x2bc   : > { %686 = vmax.xlane.f32.xlu2 %v685_v0  ;;  %v677_v1 = vpop.f32.mrf.mxu0 }
 0x2bd   : > { %v1208_v1 = vld [vmem:[%s1703_s7 + $0x8] sm:$0xff] }
 0x2c2   : > { %v658_v2 = vpop.f32.mrf.mxu3 }
 0x2c3   : > { %v1207_v2 = vld [vmem:[%s1703_s7] sm:$0xff] }
 0x2c4   : > { %680 = vmax.xlane.f32.xlu2 %v679_v3 }
 0x2ca   : > { %570 = vrot.lane.b32.xlu0 %v1559_v34, %s1403_s18 }
 0x2ce   : > { %555 = vrot.lane.b32.xlu1 %v1559_v34, %s1404_s14 }
 0x2d2   : > { %540 = vrot.lane.b32.xlu0 %v1559_v34, %s1405_s19  ;;  %s437_s19 = sand.u32 1, %s1377_s22  }
 0x328   : > { %v684_v4 = vpop.xlane.xlu1 %683 }
 0x329   : > { %v692_v5 = vsub.f32 %v637_v58, %v684_v4  ;;  %v690_v6 = vpop.xlane.xlu0 %689 }
 0x32a   : > { %v694_v7 = vsub.f32 %v675_v60, %v690_v6 }
 0x32b   : > { %v697_v9 = vmul.f32 1.442695, %v692_v5 }
 0x32c   : > { %v701_v10 = vmul.f32 1.442695, %v694_v7 }
 0x32d   : > { %1295 = vpow2.f32 %v697_v9 }
 0x32e   : > { %1297 = vpow2.f32 %v701_v10 }
 0x32f   : > { %v687_v11 = vpop.xlane.xlu2 %686 }
 0x330   : > { %v693_v12 = vsub.f32 %v656_v62, %v687_v11 }
 0x332   : > { %v699_v13 = vmul.f32 1.442695, %v693_v12 }
 0x333   : > { %v1296_v14 = vpop.eup %1295 }
 0x334   : > { %v1298_v15 = vpop.eup %1297  ;;  %1299 = vpow2.f32 %v699_v13  ;;  %v706_v16 = vsel %vm602_vm6, %v1296_v14, 0.0 }
 0x335   : > { %707 = vadd.xlane.f32.xlu2 %v706_v16  ;;  %v712_v17 = vsel %vm602_vm6, %v1298_v15, 0.0 }
 0x336   : > { %713 = vadd.xlane.f32.xlu1 %v712_v17 }
 0x337   : > { %v681_v18 = vpop.xlane.xlu2 %680 }
 0x338   : > { %v691_v19 = vsub.f32 %v618_v56, %v681_v18  ;;  %v1210_v18 = vld [vmem:[%s1704_s8 + $0x8] sm:$0xff] }
 0x33a   : > { %v1300_v20 = vpop.eup %1299  ;;  %v695_v21 = vmul.f32 1.442695, %v691_v19  ;;  %v1209_v19 = vld [vmem:[%s1704_s8] sm:$0xff] }
 0x33b   : > { %v709_v22 = vsel %vm602_vm6, %v1300_v20, 0.0 }
 0x33c   : > { %1301 = vpow2.f32 %v695_v21  ;;  %v571_v23 = vpop.permute.xlu0 %570 }
 0x33d   : > { %710 = vadd.xlane.f32.xlu2 %v709_v22  ;;  %574 = vst.msk [vmem:[#allocation4 + $0x8] sm:$0xf] %vm532_vm5, %v571_v23 }
 0x340   : > { %v556_v24 = vpop.permute.xlu1 %555 }
 0x341   : > { %559 = vst.msk [vmem:[#allocation4 + $0x4] sm:$0xf] %vm532_vm5, %v556_v24 }
 0x342   : > { %v1302_v25 = vpop.eup %1301 }
 0x343   : > { %v703_v26 = vsel %vm602_vm6, %v1302_v25, 0.0 }
 0x344   : > { %704 = vadd.xlane.f32.xlu0 %v703_v26  ;;  %v541_v27 = vpop.permute.xlu0 %540  ;;  %v600_v28 = vld [vmem:[#allocation4 + $0x8] sm:$0xf] }
 0x345   : > { %543 = vst.msk [vmem:[#allocation4] sm:$0xf] %vm532_vm5, %v541_v27  ;;  %v770_v29 = vsel %vm730_vm7, %v600_v28, 0 }
 0x346   : > { %779 = vmatpush.bf16.msrb.mxu3 %v770_v29  ;;  %v1287_v29 = vld [vmem:[%s1700_s4] ss:$0 sm:$0xff] }
 0x348   : > { %v599_v30 = vld [vmem:[#allocation4 + $0x4] sm:$0xf] }
 0x349   : > { %v751_v31 = vsel %vm730_vm7, %v599_v30, 0 }
 0x34a   : > { %760 = vmatpush.bf16.msrb.mxu2 %v751_v31 }
 0x34c   : > { %v598_v32 = vld [vmem:[#allocation4] sm:$0xf] }
 0x34d   : > { %v732_v33 = vsel %vm730_vm7, %v598_v32, 0 }
 0x34e   : > { %741 = vmatpush.bf16.msrb.mxu1 %v732_v33  ;;  %933 = vmatpush.bf16.msra.mxu2 %v1210_v18 }
 0x352   : > { %855 = vmatpush.bf16.msra.mxu1 %v1208_v1  ;;  %934 = vmatpush.bf16.msra.mxu2 %v1209_v19 }
 0x355   : > { %585 = vrot.lane.b32.xlu2 %v1559_v34, %s1406_s20  ;;  %s1145_s20 = sshll.u32 %s437_s19, 3 }
 0x356   : > { %856 = vmatpush.bf16.msra.mxu1 %v1207_v2  ;;  %s439_s0 = scalar_lea.vmem [#allocation6], %s1145_s20  ;;  %s1335_s20 = scalar_lea.hbm %s1708_s12, 16 }
 0x3a8   : > { %v708_v35 = vpop.xlane.xlu2 %707 }
 0x3a9   : > { %1303 = vrcp.f32 %v708_v35  ;;  %v714_v40 = vpop.xlane.xlu1 %713 }
 0x3af   : > { %v1304_v36 = vpop.eup %1303 }
 0x3b0   : > { %v720_v37 = vmul.f32 %v1304_v36, %v1296_v14  ;;  %v711_v38 = vpop.xlane.xlu2 %710  ;;  %v1289_v36 = vld [vmem:[%s1705_s9] ss:$0 sm:$0xff] }
 0x3b1   : > { %1305 = vrcp.f32 %v711_v38 }
 0x3b2   : > { %v724_v39 = vpack.c.bf16 %v720_v37, %v720_v37  ;;  %1307 = vrcp.f32 %v714_v40 }
 0x3b4   : > { %1162 = vmatmul.msk.bf16.vlgmr.msrb.gmra.mxu2 %vm602_vm6, %v724_v39 }
 0x3b7   : > { %v1306_v41 = vpop.eup %1305  ;;  %v705_v42 = vpop.xlane.xlu0 %704 }
 0x3b8   : > { %v721_v43 = vmul.f32 %v1306_v41, %v1300_v20  ;;  %v586_v44 = vpop.permute.xlu2 %585  ;;  %1309 = vrcp.f32 %v705_v42  ;;  %v1308_v34 = vpop.eup %1307 }
 0x3b9   : > { %589 = vst.msk [vmem:[#allocation4 + $0xc] sm:$0xf] %vm532_vm5, %v586_v44  ;;  %v722_v47 = vmul.f32 %v1308_v34, %v1298_v15 }
 0x3ba   : > { %v725_v45 = vpack.c.bf16 %v721_v43, %v721_v43  ;;  %v1214_v43 = vld [vmem:[%s1706_s10 + $0x18] sm:$0xff] }
 0x3bb   : > { %v726_v52 = vpack.c.bf16 %v722_v47, %v722_v47  ;;  %1029 = vmatpush.bf16.msra.mxu3 %v1214_v43  ;;  %v1213_v47 = vld [vmem:[%s1706_s10 + $0x10] sm:$0xff] }
 0x3bc   : > { %1163 = vmatmul.msk.bf16.vlgmr.msrb.gmra.mxu3 %vm602_vm6, %v725_v45 }
 0x3be   : > { %v1310_v46 = vpop.eup %1309 }
 0x3bf   : > { %v719_v48 = vmul.f32 %v1310_v46, %v1302_v25  ;;  %1030 = vmatpush.bf16.msra.mxu3 %v1213_v47 }
 0x3c0   : > { %v601_v49 = vld [vmem:[#allocation4 + $0xc] sm:$0xf] }
 0x3c1   : > { %v723_v50 = vpack.c.bf16 %v719_v48, %v719_v48  ;;  %v789_v51 = vsel %vm730_vm7, %v601_v49, 0 }
 0x3c2   : > { %798 = vmatpush.bf16.msra.mxu0 %v789_v51 }
 0x3c3   : > { %1161 = vmatmul.msk.bf16.vlgmr.msrb.gmra.mxu1 %vm602_vm6, %v723_v50 }
 0x3c5   : > { %1164 = vmatmul.msk.bf16.vlgmr.msra.gmra.mxu0 %vm602_vm6, %v726_v52  ;;  %v1212_v52 = vld [vmem:[%s1706_s10 + $0x8] sm:$0xff] }
 0x3c6   : > { %1031 = vmatpush.bf16.msra.mxu3 %v1212_v52 }
 0x437   : > { %v762_v53 = vpop.f32.mrf.mxu2 }
 0x438   : > { %v807_v54 = vpack.c.bf16 %v762_v53, %v762_v53 }
 0x43a   : > { %809 = vrot.lane.b32.xlu2 %v807_v54, %s1407_s27  ;;  %s1719_s27 = sshll.u32 %s1532_s17, 3 }
 0x43b   : > { %s450_s18 = scalar_lea.vmem %s1720_s1, %s1719_s27  ;;  %s1202_s27 = sshll.u32 %s1385_s24, 3 }
 0x43c   : > { %v862_v7 = vld [vmem:[%s450_s18] sm:$0xff]  ;;  %s1052_s14 = scalar_lea.hbm %s1708_s12, %s1202_s27  ;;  %s1054_s1 = sshll.u32 %s439_s0, 4  ;;  %s1055_s1 = int_to_ptr.vmem [resolvable:$true] %s1054_s1 }
 0x43d   : > { %s1056_s2 = sshll.u32 %s1052_s14, 4  ;;  %s1041_s24 = scalar_lea.sflag [#allocation7], %s437_s19  ;;  %s1057_s2 = int_to_ptr.hbm [resolvable:$true] %s1056_s2 }
 0x43e   : > { %s1329_s3 = sshra.s32 %s1057_s2, 4  ;;  %s1330_s3 = int_to_ptr.hbm [resolvable:$true] %s1329_s3 }
 0x43f   : > { %v764_v55 = vpop.f32.mrf.mxu2  ;;  %v781_v56 = vpop.f32.mrf.mxu3  ;;  %p1336_p1 = scmp.lt.s32.totalorder %s1330_s3, %s1708_s12 }
 0x440   : > { %v814_v57 = vpack.c.bf16 %v781_v56, %v781_v56  ;;  %v743_v58 = vpop.f32.mrf.mxu1  ;;  %v1211_v56 = vld [vmem:[%s1706_s10] sm:$0xff] }
 0x441   : > { %v804_v59 = vpack.c.bf16 %v743_v58, %v743_v58  ;;  %1032 = vmatpush.bf16.msra.mxu3 %v1211_v56 }
 0x442   : > { %816 = vrot.lane.b32.xlu2 %v814_v57, %s1408_s28  ;;  %v800_v60 = vpop.f32.mrf.mxu0  ;;  %s1331_s28 = scalar_lea.hbm %s1330_s3, 8 }
 0x443   : > { %806 = vst.msk [vmem:[#allocation5] sm:$0xf] %vm532_vm5, %v804_v59  ;;  %v821_v62 = vpack.c.bf16 %v800_v60, %v800_v60  ;;  %p1332_p12 = scmp.ne.s32.totalorder %s1330_s3, %s1331_s28  ;;  %p1337_p2 = scmp.lt.s32.totalorder %s1335_s20, %s1331_s28 }
 0x445   : > { %p1333_p13 = pnand %p1332_p12, %p1515_p4  ;;  %p1338_p3 = por %p1337_p2, %p1336_p1 }
 0x447   : > { %v783_v61 = vpop.f32.mrf.mxu3  ;;  %p1334_p0 = pneg %p1333_p13 }
 0x448   : > { %v745_v63 = vpop.f32.mrf.mxu1 }
 0x449   : > { %p1339_p5 = pnand %p1338_p3, %p1334_p0 }
 0x44a   : > { %823 = vrot.lane.b32.xlu2 %v821_v62, %s1409_s30  ;;  %v802_v0 = vpop.f32.mrf.mxu0 }
 0x494   : > { %v810_v3 = vpop.permute.xlu2 %809 }
 0x495   : > { %813 = vst.msk [vmem:[#allocation5] sm:$0xf] %vm812_vm8, %v810_v3 }
 0x49c   : > { %v817_v4 = vpop.permute.xlu2 %816 }
 0x49d   : > { %820 = vst.msk [vmem:[#allocation5] sm:$0xf] %vm819_vm9, %v817_v4 }
 0x4a4   : > { %v824_v5 = vpop.permute.xlu2 %823 }
 0x4a5   : > { %827 = vst.msk [vmem:[#allocation5] sm:$0xf] %vm826_vm10, %v824_v5 }
 0x4ac   : > { %v828_v6 = vld [vmem:[#allocation5] sm:$0xf] }
 0x4ad   : > { %1173 = vmatmul.msk.bf16.vlgmr.msra.gmra.mxu1 %vm459_vm0, %v828_v6 }
 0x52a   : > { %v858_v9 = vpop.f32.mrf.mxu1 }
 0x52b   : > { %v1618_v10 = vadd.f32 %v862_v7, %v858_v9 }
 0x52d   : > { %v866_v11 = vsel %vm459_vm0, %v1618_v10, 0.0 }
 0x52e   : > { %867 = vadd.xlane.f32.xlu1 %v866_v11 }
 0x532   : > { %v860_v12 = vpop.f32.mrf.mxu1 }
 0x5a1   : > { %v868_v13 = vpop.xlane.xlu1 %867 }
 0x5a2   : > { %v876_v14 = vmul.f32 %v868_v13, %v1541_v8 }
 0x5a4   : > { %v877_v15 = vsub.f32 %v1618_v10, %v876_v14 }
 0x5a6   : > { %v878_v16 = vmul.f32 %v877_v15, %v877_v15 }
 0x5a8   : > { %v879_v17 = vsel %vm459_vm0, %v878_v16, 0.0 }
 0x5a9   : > { %880 = vadd.xlane.f32.xlu2 %v879_v17 }
 0x61c   : > { %v881_v20 = vpop.xlane.xlu2 %880 }
 0x61d   : > { %v882_v21 = vmul.f32 %v881_v20, %v1541_v8  ;;  %v1288_v8 = vld [vmem:[%s1701_s5] ss:$0 sm:$0xff] }
 0x61f   : > { %v883_v22 = vadd.f32 1e-05, %v882_v21  ;;  %v1290_v21 = vld [vmem:[%s1707_s11] ss:$0 sm:$0xff] }
 0x621   : > { %1311 = vrsqrt.f32 %v883_v22  ;;  %vm890_vm12 = vweird.f32 %v883_v22 }
 0x627   : > { %v1312_v23 = vpop.eup %1311 }
 0x628   : > { %v885_v24 = vmul.f32 %v1312_v23, %v883_v22  ;;  %vm891_vm11 = vweird.f32 %v1312_v23 }
 0x629   : > { %vm892_vm13 = vmor %vm890_vm12, %vm891_vm11 }
 0x62a   : > { %v886_v25 = vmul.f32 %v1312_v23, %v885_v24 }
 0x62c   : > { %v887_v26 = vmul.f32 0.5, %v886_v25 }
 0x62e   : > { %v888_v27 = vsub.f32 1.5, %v887_v26 }
 0x630   : > { %v889_v28 = vmul.f32 %v1312_v23, %v888_v27 }
 0x632   : > { %v893_v30 = vsel %vm892_vm13, %v1312_v23, %v889_v28 }
 0x633   : > { %v894_v31 = vmul.f32 %v893_v30, %v877_v15 }
 0x635   : > { %v898_v32 = vmul.f32 %v1287_v29, %v894_v31 }
 0x637   : > { %v902_v33 = vadd.f32 %v1288_v8, %v898_v32 }
 0x639   : > { %v903_v35 = vpack.c.bf16 %v902_v33, %v902_v33 }
 0x63b   : > { %1182 = vmatmul.msk.bf16.vlgmr.msra.gmra.mxu2 %vm459_vm0, %v903_v35 }
 0x6be   : > { %v936_v37 = vpop.f32.mrf.mxu2 }
 0x6bf   : > { %v937_v38 = vadd.f32 %v1289_v36, %v936_v37 }
 0x6c1   : > { %v941_v39 = vmul.f32 0.70710677, %v937_v38  ;;  %v940_v17 = vmul.f32 0.5, %v937_v38 }
 0x6c3   : > { %v942_v40 = vmul.f32 %v941_v39, %v941_v39 }
 0x6c5   : > { %v943_v41 = vmin.f32 %v942_v40, 16.0 }
 0x6c6   : > { %v938_v42 = vpop.f32.mrf.mxu2 }
 0x6c7   : > { %v944_v44 = vmul.f32 2.1237322e-06, %v943_v41  ;;  %v955_v45 = vmul.f32 3.8918573e-05, %v943_v41 }
 0x6c9   : > { %v945_v34 = vadd.f32 0.00028619796, %v944_v44  ;;  %v956_v46 = vadd.f32 0.001143296, %v955_v45 }
 0x6cb   : > { %v946_v48 = vmul.f32 %v945_v34, %v943_v41  ;;  %v957_v49 = vmul.f32 %v956_v46, %v943_v41 }
 0x6cd   : > { %v958_v50 = vadd.f32 0.014752088, %v957_v49  ;;  %v947_v51 = vadd.f32 0.0036580483, %v946_v48 }
 0x6cf   : > { %v959_v53 = vmul.f32 %v958_v50, %v943_v41  ;;  %v948_v55 = vmul.f32 %v947_v51, %v943_v41 }
 0x6d1   : > { %v960_v54 = vadd.f32 0.112945676, %v959_v53  ;;  %v949_v59 = vadd.f32 0.05243302, %v948_v55 }
 0x6d3   : > { %v961_v57 = vmul.f32 %v960_v54, %v943_v41  ;;  %v950_v62 = vmul.f32 %v949_v59, %v943_v41 }
 0x6d5   : > { %v962_v58 = vadd.f32 0.4994258, %v961_v57  ;;  %v951_v63 = vadd.f32 0.18741608, %v950_v62 }
 0x6d7   : > { %v963_v60 = vmul.f32 %v962_v58, %v943_v41  ;;  %v952_v1 = vmul.f32 %v951_v63, %v943_v41 }
 0x6d9   : > { %v964_v61 = vadd.f32 1.0, %v963_v60  ;;  %v953_v5 = vadd.f32 1.1283791, %v952_v1 }
 0x6db   : > { %1313 = vrcp.f32 %v964_v61  ;;  %v976_v4 = vand.u32 2147483648, %v964_v61  ;;  %v974_v7 = vand.u32 2147483647, %v964_v61  ;;  %vm970_vm15 = vweird.f32 %v964_v61 }
 0x6dc   : > { %v954_v12 = vmul.f32 %v953_v5, %v941_v39 }
 0x6dd   : > { %v977_v11 = vor.u32 1.1754944e-38, %v976_v4  ;;  %vm975_vm2 = vcmp.eq.f32.partialorder %v974_v7, 8.507059e+37 }
 0x6e1   : > { %v1314_v0 = vpop.eup %1313 }
 0x6e2   : > { %v966_v2 = vmul.f32 %v1314_v0, %v964_v61  ;;  %vm971_vm14 = vweird.f32 %v1314_v0 }
 0x6e3   : > { %vm972_vm1 = vmor %vm970_vm15, %vm971_vm14 }
 0x6e4   : > { %v967_v3 = vsub.f32 1.0, %v966_v2 }
 0x6e6   : > { %v968_v6 = vmul.f32 %v1314_v0, %v967_v3 }
 0x6e8   : > { %v969_v9 = vadd.f32 %v1314_v0, %v968_v6 }
 0x6ea   : > { %v973_v13 = vsel %vm972_vm1, %v1314_v0, %v969_v9 }
 0x6eb   : > { %v978_v14 = vsel %vm975_vm2, %v977_v11, %v973_v13 }
 0x6ec   : > { %v979_v15 = vmul.f32 %v978_v14, %v954_v12 }
 0x6ee   : > { %v1183_v16 = vclamps-f32 %v979_v15, 1.0 }
 0x6f0   : > { %v982_v18 = vadd.f32 1.0, %v1183_v16 }
 0x6f2   : > { %v983_v19 = vmul.f32 %v982_v18, %v940_v17 }
 0x6f4   : > { %v984_v20 = vpack.c.bf16 %v983_v19, %v983_v19 }
 0x6f6   : > { %1200 = vmatmul.msk.bf16.vlgmr.msra.gmra.mxu3 %vm1021_vm3, %v984_v20 }
 0x779   : > { %v1034_v22 = vpop.f32.mrf.mxu3 }
 0x77a   : > { %v1035_v23 = vadd.f32 %v1290_v21, %v1034_v22 }
 0x77c   : > { %v1038_v24 = vadd.f32 %v1035_v23, %v1618_v10 }
 0x77e   : > { %1039 = vst.msk [vmem:[%s439_s0] sm:$0xff] %vm459_vm0, %v1038_v24 }
 0x77f   : > { %1342 = shalt.err (!%p1339_p5)
}
 0x780   : > { %1215 = dma.vmem_to_hbm [thread:$0]  (%p1515_p4), %s1055_s1, 128, %s1057_s2, %s1041_s24  }
 0x781   : > { %v1036_v10 = vpop.f32.mrf.mxu3 }
 0x782 PF: > { %p1221_p6 = scmp.ge.s32.totalorder %s1393_s26, 2  ;;  %s1068_s0 = sand.u32 1, %s1373_s21  }
 0x783   : > { %s1069_s19 = scalar_lea.sflag [#allocation7], %s1068_s0 }
 0x784   : > { %p1218_p7 = pnand %p1221_p6, %p1522_p8 }
 0x786   : > { %p1219_p9 = pneg %p1218_p7 }
 0x788   : > { %1368 = dma.done.wait (%p1219_p9), %s1069_s19, 128  }
 0x789   : > { %1370 = vsyncadd (%p1219_p9), %s1069_s19, 4294967168  ;;  %s25_s26 = sadd.s32 1, %s1393_s26   ;;  %s1721_s21 = smov %s1377_s22 }
 0x78a   : > { %p22_p10 = scmp.ge.s32.totalorder %s25_s26, 4   ;;  %s1722_s22 = smov %s1381_s23 }
 0x78b   : > { %s1723_s23 = smov %s1528_s16  ;;  %s1724_s24 = smov %s1389_s25 }
 0x78c   : > { %s1725_s25 = smov %s1727_s29  ;;  %24 = sbr.rel (!%p22_p10) target bundleno = 9 (0x9), region = 119 }
 0x791   :  { %1075 = vsyncpa [#allocation7], 1 }
 0x792   :  { %1077 = vsyncpa [#allocation7 + $0x1], 1 }

</bundles_post_ra>
